<compile_context>
chip_gen: v7x
topology: tpu7x:2x2x1
jax: 0.10.0
libtpu: 0.0.40
codegen_flags: <defaults>
</compile_context>

<pallas_src>
import functools
import math

import jax
import jax.numpy as jnp
from jax.experimental import pallas as pl
from jax.experimental.pallas import tpu as pltpu

# f32 MXU operands keep the demo tightly matched to the plain-JAX reference.
# Flip to jnp.bfloat16 for ~4x MXU throughput on v5e/v6e/v7x (f32 accumulation
# is kept via preferred_element_type); expect a few-1e-3 extra error.
MXU_DTYPE = jnp.float32
_VMEM_LIMIT = 32 * 1024 * 1024   # conservative: v7x only has 64 MiB VMEM


def _round_up(x, m):
    return ((x + m - 1) // m) * m


# --------------------------------------------------------------------------
# LnExpMax layer kernel
# --------------------------------------------------------------------------
def _lnexp_layer_kernel(alpha, apply_relu, mxu_dtype, f_pad,
                        p_ref, w1_ref, w2_ref, b_ref, o_ref):
    """[TM, P_pad] patch tile -> [TM, F_pad] output tile.

    Per branch:  [num | den] = [E | PE] @ [[KEK, EK], [EK, 0]]
    with E = exp(alpha*(z - rowmax(z))), z = +/- p, and EK/KEK precomputed
    host-side (column-max shifted).  The row/column shifts cancel exactly in
    num/den, so no rescaling is needed.
    """
    f32 = jnp.float32
    p = p_ref[...].astype(f32)                           # [TM, Pp]

    # Branch 1: smoothmax(p + k1), row-max shifted exp (EUP).
    m1 = jnp.max(p, axis=1, keepdims=True)
    e1 = jnp.exp(alpha * (p - m1))
    # Branch 2: smoothmax(-p + k2), its OWN max-shifted exp (no reciprocal of
    # a possibly-underflowed e1 -> no inf/NaN, no approx error).
    m2 = jnp.max(-p, axis=1, keepdims=True)
    e2 = jnp.exp(alpha * (-p - m2))

    l1 = jnp.concatenate([e1, p * e1], axis=1)           # [TM, 2*Pp]
    l2 = jnp.concatenate([e2, (-p) * e2], axis=1)

    def mm(a, b):
        return jnp.dot(a.astype(mxu_dtype), b.astype(mxu_dtype),
                       preferred_element_type=f32)

    r1 = mm(l1, w1_ref[...])                             # [TM, 2*Fp] = [num1|den1]
    r2 = mm(l2, w2_ref[...])                             # [TM, 2*Fp] = [num2|den2]

    # Exact divisions (output-sized only); approx reciprocal was the source of
    # the softmax-sum accuracy failure, so it is not used anywhere anymore.
    y = (r1[:, :f_pad] / r1[:, f_pad:]
         + r2[:, :f_pad] / r2[:, f_pad:]
         + b_ref[...].astype(f32))
    if apply_relu:
        y = jnp.maximum(y, 0.0)
    o_ref[...] = y.astype(o_ref.dtype)


def _extract_image_patches_nhwc(x, kh, kw, stride):
    """x: [N, H, W, C] -> patches [N, OH, OW, kh*kw*C], ordering (ih, iw, c)."""
    N, H, W, C = x.shape
    OH = (H - kh) // stride + 1
    OW = (W - kw) // stride + 1
    parts = []
    for ih in range(kh):
        for iw in range(kw):
            parts.append(
                x[:, ih:ih + stride * OH:stride, iw:iw + stride * OW:stride, :])
    return jnp.concatenate(parts, axis=-1), OH, OW


def _choose_tile_m(M, p_pad, f_pad, tm_max=1024, vmem_budget=24 * 1024 * 1024):
    """Pick the M-tile: as large as VMEM allows, but always >= 2 grid steps
    when M permits so v7x's two TensorCores both get work (grid axis is
    'parallel')."""
    if M <= 16:
        tm = _round_up(max(M, 1), 8)
    else:
        steps = max(2, (M + tm_max - 1) // tm_max)
        tm = _round_up((M + steps - 1) // steps, 8)

    def vmem_bytes(t):
        io = 4 * 2 * (t * p_pad + t * f_pad)                         # tiles, dbl-buffered
        wts = 4 * 2 * (2 * (2 * p_pad) * (2 * f_pad) + f_pad)        # w1, w2, bias
        tmp = 4 * t * (8 * p_pad + 5 * f_pad)                        # e/pe/concat/r/y
        return io + wts + tmp

    while vmem_bytes(tm) > vmem_budget and tm > 8:
        tm = max(8, _round_up(tm // 2, 8))
    return tm


def lnexp_max_layer(x, k1, k2, bias, *, alpha, stride=1, apply_relu=False,
                    mxu_dtype=MXU_DTYPE, tm_max=1024):
    """x: [N, H, W, C] (NHWC), k1/k2: [kh, kw, C, F], bias: [F]
    -> [N, OH, OW, F] (NHWC)."""
    kh, kw, C, F = k1.shape
    N = x.shape[0]
    alpha = float(alpha)

    patches, OH, OW = _extract_image_patches_nhwc(x, kh, kw, stride)
    P = kh * kw * C
    M = N * OH * OW
    patches = patches.reshape(M, P).astype(jnp.float32)

    p_pad = _round_up(P, 128)
    f_pad = _round_up(F, 128)

    # Weight-side precompute (constant over M), column-max stabilized.
    # NOTE: under jit with static params this folds into constants; in eager
    # use it re-runs per call (cheap at these sizes).
    a = jnp.float32(alpha)

    def prep(kf):                                     # kf: [P, F]
        c = jnp.max(kf, axis=0, keepdims=True)
        ek = jnp.exp(a * (kf - c))
        kek = kf * ek
        # pad F: EK cols -> 1 (keeps padded dens > 0), KEK cols -> 0
        ek = jnp.pad(ek, ((0, 0), (0, f_pad - F)), constant_values=1.0)
        kek = jnp.pad(kek, ((0, 0), (0, f_pad - F)))
        # pad P: rows -> 0 so padded patch columns contribute nothing (exact)
        ek = jnp.pad(ek, ((0, p_pad - P), (0, 0)))
        kek = jnp.pad(kek, ((0, p_pad - P), (0, 0)))
        top = jnp.concatenate([kek, ek], axis=1)                  # rows hit by E
        bot = jnp.concatenate([ek, jnp.zeros_like(ek)], axis=1)   # rows hit by PE
        return jnp.concatenate([top, bot], axis=0)                # [2*Pp, 2*Fp]

    w1 = prep(k1.reshape(P, F).astype(jnp.float32))
    w2 = prep(k2.reshape(P, F).astype(jnp.float32))
    bias_p = jnp.pad(bias.astype(jnp.float32).reshape(1, F),
                     ((0, 0), (0, f_pad - F)))

    tm = _choose_tile_m(M, p_pad, f_pad, tm_max=tm_max)
    grid_m = (M + tm - 1) // tm
    m_pad = grid_m * tm
    patches = jnp.pad(patches, ((0, m_pad - M), (0, p_pad - P)))

    out = pl.pallas_call(
        functools.partial(_lnexp_layer_kernel, alpha, bool(apply_relu),
                          mxu_dtype, f_pad),
        out_shape=jax.ShapeDtypeStruct((m_pad, f_pad), jnp.float32),
        grid=(grid_m,),
        in_specs=[
            pl.BlockSpec((tm, p_pad), lambda i: (i, 0)),              # patches
            pl.BlockSpec((2 * p_pad, 2 * f_pad), lambda i: (0, 0)),   # branch-1 W
            pl.BlockSpec((2 * p_pad, 2 * f_pad), lambda i: (0, 0)),   # branch-2 W
            pl.BlockSpec((1, f_pad), lambda i: (0, 0)),               # bias
        ],
        out_specs=pl.BlockSpec((tm, f_pad), lambda i: (i, 0)),
        compiler_params=pltpu.CompilerParams(
            dimension_semantics=("parallel",),
            vmem_limit_bytes=_VMEM_LIMIT),
    )(patches, w1, w2, bias_p)

    return out[:M, :F].reshape(N, OH, OW, F)              # stays NHWC


# --------------------------------------------------------------------------
# Flatten -> Linear -> Softmax head kernel
# --------------------------------------------------------------------------
def _head_kernel(x_ref, w_ref, b_ref, o_ref):
    f32 = jnp.float32
    x = x_ref[...].astype(f32)
    logits = jnp.dot(x, w_ref[...].astype(f32),
                     preferred_element_type=f32) + b_ref[...].astype(f32)
    m = jnp.max(logits, axis=1, keepdims=True)
    e = jnp.exp(logits - m)
    s = jnp.sum(e, axis=1, keepdims=True)
    o_ref[...] = (e / s).astype(o_ref.dtype)      # exact divide: sum == 1


def linear_softmax_head(x, w, b):
    """x: [N, D], w: [D, K], b: [K] -> softmax(x @ w + b) : [N, K]."""
    N, D = x.shape
    K = w.shape[1]
    n_pad = _round_up(N, 8)
    d_pad = _round_up(D, 128)
    k_pad = _round_up(K, 128)

    xp = jnp.pad(x.astype(jnp.float32), ((0, n_pad - N), (0, d_pad - D)))
    wp = jnp.pad(w.astype(jnp.float32), ((0, d_pad - D), (0, k_pad - K)))
    # padded logit columns get a huge negative bias -> exp underflows to 0
    bp = jnp.pad(b.astype(jnp.float32).reshape(1, K),
                 ((0, 0), (0, k_pad - K)), constant_values=-1e30)

    out = pl.pallas_call(
        _head_kernel,
        out_shape=jax.ShapeDtypeStruct((n_pad, k_pad), jnp.float32),
        grid=(1,),
        in_specs=[
            pl.BlockSpec((n_pad, d_pad), lambda i: (0, 0)),
            pl.BlockSpec((d_pad, k_pad), lambda i: (0, 0)),
            pl.BlockSpec((1, k_pad), lambda i: (0, 0)),
        ],
        out_specs=pl.BlockSpec((n_pad, k_pad), lambda i: (0, 0)),
        compiler_params=pltpu.CompilerParams(vmem_limit_bytes=_VMEM_LIMIT),
    )(xp, wp, bp)
    return out[:N, :K]


# --------------------------------------------------------------------------
# LSE_Net_MAE: params + forward
# --------------------------------------------------------------------------
def _xavier_uniform(key, shape):
    kh, kw, cin, cout = shape
    fan_in = kh * kw * cin
    fan_out = kh * kw * cout
    bound = math.sqrt(6.0 / (fan_in + fan_out))
    return jax.random.uniform(key, shape, jnp.float32, -bound, bound)


def init_lse_net_params(key, depth, shape, alpha):
    C, H, W = shape
    cfgs = [(32, C, float(alpha))]
    c_in, h, w = 32, H - 2, W - 2
    for _ in range(depth):
        cfgs.append((16, c_in, 2.0))
        c_in, h, w = 16, h - 2, w - 2
    keys = jax.random.split(key, 2 * len(cfgs) + 2)
    layers = []
    for i, (f, cin, a) in enumerate(cfgs):
        k1 = _xavier_uniform(keys[2 * i], (3, 3, cin, f))
        k2 = _xavier_uniform(keys[2 * i + 1], (3, 3, cin, f))
        layers.append((k1, k2, jnp.zeros((f,), jnp.float32), a))
    d = c_in * h * w
    bound = 1.0 / math.sqrt(d)
    w_lin = jax.random.uniform(keys[-2], (d, 10), jnp.float32, -bound, bound)
    b_lin = jax.random.uniform(keys[-1], (10,), jnp.float32, -bound, bound)
    return {"layers": layers, "w": w_lin, "b": b_lin}


def lse_net_forward(x, params, *, mxu_dtype=MXU_DTYPE):
    """x: [N, C, H, W] (PyTorch layout) -> softmax probabilities [N, 10]."""
    h = jnp.transpose(x, (0, 2, 3, 1))                 # NCHW -> NHWC once
    for (k1, k2, b, a) in params["layers"]:
        h = lnexp_max_layer(h, k1, k2, b, alpha=a, apply_relu=True,
                            mxu_dtype=mxu_dtype)
    h = jnp.transpose(h, (0, 3, 1, 2))                 # NHWC -> NCHW once,
    flat = h.reshape(h.shape[0], -1)                   # preserving torch flatten order
    return linear_softmax_head(flat, params["w"], params["b"])


# --------------------------------------------------------------------------
# Plain-JAX references (broadcast form, mirrors the PyTorch math; NCHW)
# --------------------------------------------------------------------------
def _lnexp_layer_ref(x, k1, k2, bias, alpha, apply_relu=False):
    kh, kw, C, F = k1.shape
    patches, OH, OW = _extract_image_patches_nhwc(
        jnp.transpose(x, (0, 2, 3, 1)), kh, kw, 1)
    N = x.shape[0]
    P = kh * kw * C
    p = patches.reshape(N * OH * OW, P).astype(jnp.float32)

    def smax(z):
        e = jnp.exp(alpha * z)
        return jnp.sum(z * e, axis=1) / jnp.sum(e, axis=1)

    k1f = k1.reshape(P, F).astype(jnp.float32)
    k2f = k2.reshape(P, F).astype(jnp.float32)
    y = (smax(p[:, :, None] + k1f[None]) + smax((-p)[:, :, None] + k2f[None])
         + bias[None, :].astype(jnp.float32))
    if apply_relu:
        y = jnp.maximum(y, 0.0)
    return jnp.transpose(y.reshape(N, OH, OW, F), (0, 3, 1, 2))


def _lse_net_ref(x, params):
    h = x
    for (k1, k2, b, a) in params["layers"]:
        h = _lnexp_layer_ref(h, k1, k2, b, a, apply_relu=True)
    flat = h.reshape(h.shape[0], -1)
    logits = flat @ params["w"] + params["b"]
    return jax.nn.softmax(logits, axis=1)


# --------------------------------------------------------------------------
if __name__ == "__main__":
    depth = 1
    shape = (4, 16, 16)          # (C, H, W)
    alpha = 1.0
    N = 2

    key = jax.random.PRNGKey(0)
    k_x, k_p = jax.random.split(key)
    x = jax.random.normal(k_x, (N,) + shape, jnp.float32)     # NCHW
    params = init_lse_net_params(k_p, depth, shape, alpha)

    # Standalone layer check (first LnExpMax layer, no ReLU).
    x_nhwc = jnp.transpose(x, (0, 2, 3, 1))
    k1, k2, b, a = params["layers"][0]
    y_layer_nhwc = jax.block_until_ready(
        lnexp_max_layer(x_nhwc, k1, k2, b, alpha=a, apply_relu=False))
    y_layer = jnp.transpose(y_layer_nhwc, (0, 3, 1, 2))       # -> NCHW for compare
    y_layer_ref = _lnexp_layer_ref(x, k1, k2, b, a, apply_relu=False)
    assert y_layer.shape == (N, 32, 14, 14), y_layer.shape
    err_l = float(jnp.max(jnp.abs(y_layer - y_layer_ref)))
    assert jnp.allclose(y_layer, y_layer_ref, atol=5e-3, rtol=5e-3), err_l

    # Full LSE_Net_MAE forward.
    y = jax.block_until_ready(lse_net_forward(x, params))
    y_ref = _lse_net_ref(x, params)
    assert y.shape == (N, 10), y.shape
    assert bool(jnp.all(jnp.isfinite(y)))
    assert jnp.allclose(jnp.sum(y, axis=1), 1.0, atol=1e-3)
    err_n = float(jnp.max(jnp.abs(y - y_ref)))
    assert jnp.allclose(y, y_ref, atol=1e-2), err_n

    print("KERNEL_OK")
</pallas_src>

<mosaic_0001>
module attributes {stable_mosaic.version = 11 : i64} {
  func.func @_lnexp_layer_kernel(%arg0: i32, %arg1: memref<200x128xf32, #tpu.memory_space<vmem>>, %arg2: memref<256x256xf32, #tpu.memory_space<vmem>>, %arg3: memref<256x256xf32, #tpu.memory_space<vmem>>, %arg4: memref<1x128xf32, #tpu.memory_space<vmem>>, %arg5: memref<200x128xf32, #tpu.memory_space<vmem>>) attributes {dimension_semantics = [#tpu.dimension_semantics<parallel>], iteration_bounds = array<i64: 2>, scalar_prefetch = 0 : i64, scratch_operands = 0 : i64, tpu.core_type = #tpu.core_type<tc>, window_params = [{transform_indices = @transform_0, window_bounds = array<i64: 200, 128>}, {pipeline_mode = #tpu.pipeline_mode<synchronous>, transform_indices = @transform_1, window_bounds = array<i64: 256, 256>}, {pipeline_mode = #tpu.pipeline_mode<synchronous>, transform_indices = @transform_2, window_bounds = array<i64: 256, 256>}, {pipeline_mode = #tpu.pipeline_mode<synchronous>, transform_indices = @transform_3, window_bounds = array<i64: 1, 128>}, {transform_indices = @transform_4, window_bounds = array<i64: 200, 128>}]} {
    %c0 = arith.constant 0 : index
    %c0_0 = arith.constant 0 : index
    %0 = vector.load %arg1[%c0, %c0_0] : memref<200x128xf32, #tpu.memory_space<vmem>>, vector<200x128xf32>
    %cst = arith.constant dense<0xFF800000> : vector<200xf32>
    %1 = vector.multi_reduction <maximumf>, %0, %cst [1] : vector<200x128xf32> to vector<200xf32>
    %2 = vector.shape_cast %1 : vector<200xf32> to vector<200x1xf32>
    %3 = vector.broadcast %2 : vector<200x1xf32> to vector<200x128xf32>
    %4 = arith.subf %0, %3 : vector<200x128xf32>
    %cst_1 = arith.constant 1.000000e+00 : f32
    %5 = vector.broadcast %cst_1 : f32 to vector<200x128xf32>
    %6 = arith.mulf %5, %4 : vector<200x128xf32>
    %7 = math.exp %6 : vector<200x128xf32>
    %cst_2 = arith.constant 0.000000e+00 : f32
    %8 = vector.broadcast %cst_2 : f32 to vector<200x128xf32>
    %9 = arith.subf %8, %0 : vector<200x128xf32>
    %cst_3 = arith.constant dense<0xFF800000> : vector<200xf32>
    %10 = vector.multi_reduction <maximumf>, %9, %cst_3 [1] : vector<200x128xf32> to vector<200xf32>
    %11 = vector.shape_cast %10 : vector<200xf32> to vector<200x1xf32>
    %cst_4 = arith.constant 0.000000e+00 : f32
    %12 = vector.broadcast %cst_4 : f32 to vector<200x128xf32>
    %13 = arith.subf %12, %0 : vector<200x128xf32>
    %14 = vector.broadcast %11 : vector<200x1xf32> to vector<200x128xf32>
    %15 = arith.subf %13, %14 : vector<200x128xf32>
    %cst_5 = arith.constant 1.000000e+00 : f32
    %16 = vector.broadcast %cst_5 : f32 to vector<200x128xf32>
    %17 = arith.mulf %16, %15 : vector<200x128xf32>
    %18 = math.exp %17 : vector<200x128xf32>
    %19 = arith.mulf %0, %7 : vector<200x128xf32>
    %20 = tpu.concatenate %7, %19 in 1 : vector<200x128xf32>, vector<200x128xf32> -> vector<200x256xf32>
    %cst_6 = arith.constant 0.000000e+00 : f32
    %21 = vector.broadcast %cst_6 : f32 to vector<200x128xf32>
    %22 = arith.subf %21, %0 : vector<200x128xf32>
    %23 = arith.mulf %22, %18 : vector<200x128xf32>
    %24 = tpu.concatenate %18, %23 in 1 : vector<200x128xf32>, vector<200x128xf32> -> vector<200x256xf32>
    %c0_7 = arith.constant 0 : index
    %c0_8 = arith.constant 0 : index
    %25 = vector.load %arg2[%c0_7, %c0_8] : memref<256x256xf32, #tpu.memory_space<vmem>>, vector<256x256xf32>
    %cst_9 = arith.constant dense<0.000000e+00> : vector<200x256xf32>
    %26 = tpu.matmul %20, %25, %cst_9 {dimension_numbers = #tpu.dot_dimension_numbers<[1], [0], [0], [1], [0, 0, 1, 1], [], []>} : vector<200x256xf32>, vector<256x256xf32>, vector<200x256xf32> -> vector<200x256xf32>
    %c0_10 = arith.constant 0 : index
    %c0_11 = arith.constant 0 : index
    %27 = vector.load %arg3[%c0_10, %c0_11] : memref<256x256xf32, #tpu.memory_space<vmem>>, vector<256x256xf32>
    %cst_12 = arith.constant dense<0.000000e+00> : vector<200x256xf32>
    %28 = tpu.matmul %24, %27, %cst_12 {dimension_numbers = #tpu.dot_dimension_numbers<[1], [0], [0], [1], [0, 0, 1, 1], [], []>} : vector<200x256xf32>, vector<256x256xf32>, vector<200x256xf32> -> vector<200x256xf32>
    %29 = vector.extract_strided_slice %26 {offsets = [0, 0], sizes = [200, 128], strides = [1, 1]} : vector<200x256xf32> to vector<200x128xf32>
    %30 = vector.extract_strided_slice %26 {offsets = [0, 128], sizes = [200, 128], strides = [1, 1]} : vector<200x256xf32> to vector<200x128xf32>
    %31 = arith.divf %29, %30 : vector<200x128xf32>
    %32 = vector.extract_strided_slice %28 {offsets = [0, 0], sizes = [200, 128], strides = [1, 1]} : vector<200x256xf32> to vector<200x128xf32>
    %33 = vector.extract_strided_slice %28 {offsets = [0, 128], sizes = [200, 128], strides = [1, 1]} : vector<200x256xf32> to vector<200x128xf32>
    %34 = arith.divf %32, %33 : vector<200x128xf32>
    %35 = arith.addf %31, %34 : vector<200x128xf32>
    %c0_13 = arith.constant 0 : index
    %c0_14 = arith.constant 0 : index
    %36 = vector.load %arg4[%c0_13, %c0_14] : memref<1x128xf32, #tpu.memory_space<vmem>>, vector<1x128xf32>
    %37 = vector.broadcast %36 : vector<1x128xf32> to vector<200x128xf32>
    %38 = arith.addf %35, %37 : vector<200x128xf32>
    %c0_15 = arith.constant 0 : index
    %c0_16 = arith.constant 0 : index
    %39 = vector.load %arg5[%c0_15, %c0_16] : memref<200x128xf32, #tpu.memory_space<vmem>>, vector<200x128xf32>
    tpu.vector_store %arg5[%c0_15, %c0_16], %38 {strides = array<i32>} : memref<200x128xf32, #tpu.memory_space<vmem>>, vector<200x128xf32>,
    return
  }
  func.func @transform_0(%arg0: i32) -> (i32, i32) {
    %c0_i32 = arith.constant 0 : i32
    %c0_i32_0 = arith.constant 0 : i32
    return %arg0, %c0_i32 : i32, i32
  }
  func.func @transform_1(%arg0: i32) -> (i32, i32) {
    %c0_i32 = arith.constant 0 : i32
    %c0_i32_0 = arith.constant 0 : i32
    %c0_i32_1 = arith.constant 0 : i32
    return %c0_i32, %c0_i32_0 : i32, i32
  }
  func.func @transform_2(%arg0: i32) -> (i32, i32) {
    %c0_i32 = arith.constant 0 : i32
    %c0_i32_0 = arith.constant 0 : i32
    %c0_i32_1 = arith.constant 0 : i32
    return %c0_i32, %c0_i32_0 : i32, i32
  }
  func.func @transform_3(%arg0: i32) -> (i32, i32) {
    %c0_i32 = arith.constant 0 : i32
    %c0_i32_0 = arith.constant 0 : i32
    %c0_i32_1 = arith.constant 0 : i32
    return %c0_i32, %c0_i32_0 : i32, i32
  }
  func.func @transform_4(%arg0: i32) -> (i32, i32) {
    %c0_i32 = arith.constant 0 : i32
    %c0_i32_0 = arith.constant 0 : i32
    return %arg0, %c0_i32 : i32, i32
  }
}

</mosaic_0001>

<bundles_post_ra>
// kernel: tpu_custom_call.1
= control target key start
LH: loop header
LB: loop body
LE: loop exit
PB: predicated region body
PF: predicated region fallthrough
CT: control target
= control target key end

     0   :  { %9 = vsyncpa [#allocation3], 0  ;;  %s2652_s0 = inlined_call_operand.hbm [shape: f32[400,128], index: 0, kind: input, shape index: {}]   ;;  %s2653_s1 = inlined_call_operand.hbm [shape: f32[256,256], index: 1, kind: input, shape index: {}]   ;;  %s2654_s2 = inlined_call_operand.hbm [shape: f32[256,256], index: 2, kind: input, shape index: {}]   ;;  %s2655_s3 = inlined_call_operand.vmem [shape: f32[1,128], index: 3, kind: input, shape index: {}]   ;;  %s2656_s4 = inlined_call_operand.hbm [shape: f32[400,128], index: 4, kind: output, shape index: {}]  }
   0x1   :  { %11 = vsyncpa [#allocation3 + $0x1], 0 }
   0x2   :  { %12 = vsyncpa [#allocation6], 0 }
   0x3   :  { %13 = vsyncpa [#allocation4], 0 }
   0x4   :  { %15 = vsyncpa [#allocation4 + $0x1], 0  ;;  %s2054_s15 = smov 0   ;;  %s2056_s16 = smov 0  }
   0x5   :  { %s2058_s17 = smov 0   ;;  %s2060_s18 = smov 0  }
   0x6 LB: > { %s2075_s19 = sadd.s32 4294967295, %s2017_s18   ;;  %s1443_s20 = sadd.s32 4294967294, %s2017_s18   ;;  %s2017_s18 = sphi %s2060_s18, %s2688_s18   ;;  %s2013_s17 = sphi %s2058_s17, %s2687_s17   ;;  %s2009_s16 = sphi %s2056_s16, %s2686_s16   ;;  %s2005_s15 = sphi %s2054_s15, %s2685_s15  }
   0x7   : > { %p41_p0 = scmp.ne.s32.totalorder %s2009_s16, %s2005_s15  ;;  %p2657_p1 = scmp.eq.s32.totalorder %s2075_s19, 0 }
   0x8   : > { %p134_p3 = scmp.eq.s32.totalorder %s1443_s20, 1  ;;  %p1444_p5 = scmp.ge.s32.totalorder %s2017_s18, 1 }
   0x9   : > { %p2084_p4 = por %p2657_p1, %p41_p0  ;;  %p141_p7 = scmp.lt.s32.totalorder %s2017_s18, 3 }
   0xa   : > { %p2089_p6 = por %p134_p3, %p41_p0  ;;  %s2019_s24 = smov [#allocation5]  }
   0xb   : > { %s2666_s21 = scalar_select %p2084_p4, 1, 0 }
   0xc   : > { %s2667_s22 = scalar_select %p2089_p6, 1, 0 }
   0xd   : > { %p2094_p8 = pnand %p1444_p5, %p141_p7  ;;  %s153_s25 = sshll.u32 %s2019_s24, 4  ;;  %s2098_s25 = int_to_ptr.vmem [resolvable:$true] %s153_s25 }
   0xe   : > { %s2020_s27 = smov [#allocation7]   ;;  %s1861_s5 = scalar_lea.hbm %s2653_s1, 8192 }
   0xf   : > { %p1600_p9 = pneg %p2094_p8  ;;  %s166_s28 = sshll.u32 %s2020_s27, 4  ;;  %s2109_s28 = int_to_ptr.vmem [resolvable:$true] %s166_s28 }
  0x10   : > { %p1862_p12 = scmp.ne.s32.totalorder %s2653_s1, %s1861_s5  ;;  %p1868_p5 = scmp.lt.u32.totalorder %s1861_s5, %s2653_s1 }
  0x11   : > { %p2105_p11 = pnand %p1600_p9, %p2657_p1 }
  0x13   : > { %p1863_p13 = pneg %p2105_p11 }
  0x15   : > { %p1864_p0 = pnand %p1863_p13, %p1862_p12 }
  0x17   : > { %p1865_p3 = pneg %p1864_p0 }
  0x19   : > { %p1870_p7 = pnand %p1868_p5, %p1865_p3 }
  0x1b   : > { %1873 = shalt.err (!%p1870_p7)
}
  0x1c   : > { %s1874_s10 = scalar_lea.vmem %s2098_s25, 8192  ;;  %p1882_p2 = scmp.lt.s32.totalorder %s2098_s25, %s2098_s25 }
  0x1d   : > { %p1875_p9 = scmp.ne.s32.totalorder %s2098_s25, %s1874_s10  ;;  %p1883_p12 = scmp.lt.s32.totalorder %s1874_s10, %s1874_s10 }
  0x1f   : > { %p1877_p10 = pnand %p1875_p9, %p1863_p13  ;;  %p1884_p0 = por %p1883_p12, %p1882_p2 }
  0x21   : > { %p1878_p1 = pneg %p1877_p10 }
  0x23   : > { %p1885_p6 = pnand %p1884_p0, %p1878_p1 }
  0x25   : > { %1888 = shalt.err (!%p1885_p6)
}
  0x26   : > { %s2021_s11 = smov 256   ;;  %s2022_s12 = smov 16  }
  0x27   : > { %1603 = dma.hbm_to_vmem [thread:$0]  (!%p2105_p11), %s2653_s1, 8192, %s2098_s25, [#allocation6], %s2021_s11, %s2021_s11, %s2022_s12  }
  0x28   : > { %s1889_s27 = scalar_lea.hbm %s2654_s2, 8192 }
  0x29   : > { %p1890_p2 = scmp.ne.s32.totalorder %s2654_s2, %s1889_s27  ;;  %p1896_p10 = scmp.lt.u32.totalorder %s1889_s27, %s2654_s2 }
  0x2b   : > { %p1892_p1 = pnand %p1890_p2, %p1863_p13 }
  0x2d   : > { %p1893_p6 = pneg %p1892_p1 }
  0x2f   : > { %p1898_p3 = pnand %p1896_p10, %p1893_p6 }
  0x31   : > { %1901 = shalt.err (!%p1898_p3)
}
  0x32   : > { %s1902_s25 = scalar_lea.vmem %s2109_s28, 8192  ;;  %p1910_p12 = scmp.lt.s32.totalorder %s2109_s28, %s2109_s28 }
  0x33   : > { %p1903_p5 = scmp.ne.s32.totalorder %s2109_s28, %s1902_s25  ;;  %p1911_p0 = scmp.lt.s32.totalorder %s1902_s25, %s1902_s25 }
  0x35   : > { %p1905_p7 = pnand %p1903_p5, %p1863_p13  ;;  %p1912_p2 = por %p1911_p0, %p1910_p12 }
  0x37   : > { %p1906_p9 = pneg %p1905_p7 }
  0x39   : > { %p1913_p1 = pnand %p1912_p2, %p1906_p9 }
  0x3b   : > { %1916 = shalt.err (!%p1913_p1)
}
  0x3c   : > { %1606 = dma.hbm_to_vmem [thread:$0]  (!%p2105_p11), %s2654_s2, 8192, %s2109_s28, [#allocation6], %s2021_s11, %s2021_s11, %s2022_s12  }
  0x3d   : > { %s2164_s9 = sadd.s32 1, %s2017_s18   ;;  %s28_s26 = sadd.s32 1, %s2013_s17 }
  0x3e   : > { %s25_s10 = ssub.s32 %s2017_s18, %s2164_s9  ;;  %p35_p13 = scmp.ne.s32.totalorder %s2013_s17, %s2009_s16 }
  0x3f   : > { %p26_p6 = scmp.eq.s32.totalorder %s25_s10, 0  ;;  %p36_p10 = scmp.eq.s32.totalorder %s2017_s18, 0 }
  0x40   : > { %p2670_p3 = scmp.eq.s32.totalorder %s2075_s19, 1  ;;  %p1617_p7 = scmp.lt.s32.totalorder %s2017_s18, 2 }
  0x41   : > { %s2180_s14 = scalar_select %p26_p6, %s2013_s17, %s28_s26  }
  0x42   : > { %p2174_p5 = por %p2670_p3, %p35_p13  ;;  %p37_p9 = por %p36_p10, %p35_p13 }
  0x43   : > { %s183_s20 = sand.u32 1, %s2013_s17   ;;  %s1456_s28 = smul.u32 3200, %s2017_s18 }
  0x44   : > { %s2671_s13 = scalar_select %p2174_p5, 1, 0 }
  0x45   : > { %s1586_s24 = smul.u32 200, %s183_s20  ;;  %p2184_p11 = pnand %p1617_p7, %p37_p9 }
  0x46   : > { %s2191_s29 = scalar_lea.hbm %s2652_s0, %s1456_s28  ;;  %s2195_s6 = scalar_lea.sflag [#allocation3], %s183_s20 }
  0x47   : > { %s187_s30 = scalar_lea.vmem [#allocation2], %s1586_s24  ;;  %s1917_s25 = scalar_lea.hbm %s2191_s29, 3200 }
  0x48   : > { %s194_s5 = sshll.u32 %s187_s30, 4  ;;  %p1918_p12 = scmp.ne.s32.totalorder %s2191_s29, %s1917_s25  ;;  %s2193_s5 = int_to_ptr.vmem [resolvable:$true] %s194_s5 }
  0x49   : > { %p1919_p0 = pneg %p2184_p11  ;;  %s1922_s26 = scalar_lea.hbm %s2652_s0, 6400 }
  0x4a   : > { %p1923_p13 = scmp.lt.u32.totalorder %s2191_s29, %s2652_s0  ;;  %p1924_p6 = scmp.lt.u32.totalorder %s1922_s26, %s1917_s25 }
  0x4b   : > { %p1920_p2 = pnand %p1919_p0, %p1918_p12  ;;  %p1926_p3 = scmp.lt.u32.totalorder %s1917_s25, %s2191_s29 }
  0x4c   : > { %p1925_p10 = por %p1924_p6, %p1923_p13 }
  0x4d   : > { %p1921_p1 = pneg %p1920_p2 }
  0x4e   : > { %p1927_p7 = por %p1926_p3, %p1925_p10 }
  0x50   : > { %p1928_p9 = pnand %p1927_p7, %p1921_p1 }
  0x52   : > { %1931 = shalt.err (!%p1928_p9)
}
  0x53   : > { %s1932_s20 = scalar_lea.vmem %s2193_s5, 3200  ;;  %s2023_s24 = smov [#allocation2]  }
  0x54   : > { %p1933_p12 = scmp.ne.s32.totalorder %s2193_s5, %s1932_s20  ;;  %s1937_s12 = sshll.u32 %s2023_s24, 4  ;;  %s1938_s12 = int_to_ptr.vmem [resolvable:$false] %s1937_s12 }
  0x55   : > { %s1939_s27 = scalar_lea.vmem %s1938_s12, 6400  ;;  %p1940_p4 = scmp.lt.s32.totalorder %s2193_s5, %s1938_s12 }
  0x56   : > { %p1935_p2 = pnand %p1933_p12, %p1919_p0  ;;  %p1941_p13 = scmp.lt.s32.totalorder %s1939_s27, %s1932_s20 }
  0x58   : > { %p1936_p5 = pneg %p1935_p2  ;;  %p1942_p6 = por %p1941_p13, %p1940_p4 }
  0x5a   : > { %p1943_p10 = pnand %p1942_p6, %p1936_p5 }
  0x5c   : > { %1946 = shalt.err (!%p1943_p10)
}
  0x5d   : > { %s2024_s30 = smov 128   ;;  %s2025_s25 = smov 8  }
  0x5e   : > { %1610 = dma.hbm_to_vmem [thread:$0]  (!%p2184_p11), %s2191_s29, 3200, %s2193_s5, %s2195_s6, %s2024_s30, %s2024_s30, %s2025_s25  }
  0x5f   : > { %206 = sbr.rel (%p2094_p8) target bundleno = 616 (0x268), region = 36 }
  0x66   : > { %s2226_s7 = sand.u32 1, %s2009_s16   ;;  %p2673_p4 = scmp.ne.s32.totalorder %s2666_s21, 0 }
  0x67   : > { %s1587_s8 = smul.u32 200, %s2226_s7  ;;  %s209_s26 = scalar_lea.sflag [#allocation3], %s2226_s7 }
  0x69   : > { %s2232_s10 = scalar_lea.vmem [#allocation2], %s1587_s8 }
  0x6a   : > { %1992 = dma.done.wait (%p2673_p4), %s209_s26, 3200  }
  0x6b   : > { %1994 = vsyncadd (%p2673_p4), %s209_s26, 4294964096  ;;  %p2674_p5 = scmp.eq.s32.totalorder %s2075_s19, 0 }
  0x6d   : > { %1996 = dma.done.wait (%p2674_p5), [#allocation6], 16384   ;;  %p2675_p8 = pmov %p2674_p5 }
  0x6e   : > { %v2243_v0 = vld [vmem:[%s2232_s10] sm:$0xff]  ;;  %v2246_v1 = vld [vmem:[%s2232_s10 + $0x8] sm:$0xff]  ;;  %v2257_v4 = vld [vmem:[%s2232_s10 + $0x10] sm:$0xff]  ;;  %s2550_s11 = scalar_lea.vmem [#allocation8], %s1587_s8  ;;  %s1457_s29 = smul.u32 3200, %s2075_s19 }
  0x6f   : > { %1998 = vsyncadd (%p2675_p8), [#allocation6], 4294950912  ;;  %272 = vmax.xlane.f32.xlu0 %v2243_v0  ;;  %274 = vmax.xlane.f32.xlu1 %v2246_v1  ;;  %v2251_v2 = vsub.f32 0.0, %v2243_v0  ;;  %v2254_v3 = vsub.f32 0.0, %v2246_v1  ;;  %v2262_v5 = vsub.f32 0.0, %v2257_v4  ;;  %v2265_v6 = vld [vmem:[%s2232_s10 + $0x18] sm:$0xff] }
  0x70   : > { %v598_v7 = vld [vmem:[#allocation5 + $0x8] sm:$0xff]  ;;  %v600_v8 = vld [vmem:[#allocation5 + $0x18] sm:$0xff]  ;;  %v2270_v9 = vsub.f32 0.0, %v2265_v6  ;;  %v597_v11 = vld [vmem:[#allocation5] sm:$0xff]  ;;  %s1351_s5 = sshll.u32 %s2550_s11, 4  ;;  %s2604_s20 = scalar_lea.hbm %s2656_s4, %s1457_s29  ;;  %s2606_s5 = int_to_ptr.vmem [resolvable:$true] %s1351_s5 }
  0x71   : > { %v1458_v10 = vpack.c.bf16 %v600_v8, %v598_v7  ;;  %v599_v12 = vld [vmem:[#allocation5 + $0x10] sm:$0xff]  ;;  %v602_v13 = vld [vmem:[#allocation5 + $0x28] sm:$0xff]  ;;  %v604_v16 = vld [vmem:[#allocation5 + $0x38] sm:$0xff]  ;;  %s1338_s19 = scalar_lea.sflag [#allocation4], %s2226_s7  ;;  %s1947_s24 = scalar_lea.vmem %s2606_s5, 3200 }
  0x72   : > { %v2273_v14 = vld [vmem:[%s2232_s10 + $0x20] sm:$0xff]  ;;  %v1460_v15 = vpack.c.bf16 %v599_v12, %v597_v11  ;;  %v877_v17 = vld [vmem:[#allocation7 + $0x8] sm:$0xff]  ;;  %v1462_v19 = vpack.c.bf16 %v604_v16, %v602_v13  ;;  %v601_v21 = vld [vmem:[#allocation5 + $0x20] sm:$0xff]  ;;  %p1948_p11 = scmp.ne.s32.totalorder %s2606_s5, %s1947_s24  ;;  %p2682_p0 = scmp.ne.s32.totalorder %s2671_s13, 0 }
  0x73   : > { %422 = vmax.xlane.f32.xlu0 %v2251_v2  ;;  %424 = vmax.xlane.f32.xlu1 %v2254_v3  ;;  %v879_v18 = vld [vmem:[#allocation7 + $0x18] sm:$0xff]  ;;  %v603_v22 = vld [vmem:[#allocation5 + $0x30] sm:$0xff]  ;;  %v876_v23 = vld [vmem:[#allocation7] sm:$0xff]  ;;  %v2278_v28 = vsub.f32 0.0, %v2273_v14  ;;  %s2026_s12 = smov [#allocation8]  }
  0x74   : > { %1459 = vmatprep.subr.bf16.mxu0 %v1458_v10  ;;  %v1522_v20 = vpack.c.bf16 %v879_v18, %v877_v17  ;;  %v1464_v24 = vpack.c.bf16 %v603_v22, %v601_v21  ;;  %v878_v25 = vld [vmem:[#allocation7 + $0x10] sm:$0xff]  ;;  %v606_v26 = vld [vmem:[#allocation5 + $0x48] sm:$0xff]  ;;  %v608_v27 = vld [vmem:[#allocation5 + $0x58] sm:$0xff]  ;;  %p1949_p1 = pnand %p1948_p11, %p2682_p0  ;;  %s1951_s27 = sshll.u32 %s2026_s12, 4  ;;  %s1952_s27 = int_to_ptr.vmem [resolvable:$false] %s1951_s27 }
  0x75   : > { %1461 = vmatpush1.bf16.msra.mxu0 %v1460_v15  ;;  %v1524_v29 = vpack.c.bf16 %v878_v25, %v876_v23  ;;  %v881_v30 = vld [vmem:[#allocation7 + $0x28] sm:$0xff]  ;;  %v883_v31 = vld [vmem:[#allocation7 + $0x38] sm:$0xff]  ;;  %v605_v32 = vld [vmem:[#allocation5 + $0x40] sm:$0xff]  ;;  %v1466_v33 = vpack.c.bf16 %v608_v27, %v606_v26  ;;  %s1953_s30 = scalar_lea.vmem %s1952_s27, 6400  ;;  %p1954_p7 = scmp.lt.s32.totalorder %s2606_s5, %s1952_s27 }
  0x76   : > { %1463 = vmatprep.subr.bf16.mxu0 %v1462_v19  ;;  %1523 = vmatprep.subr.bf16.mxu1 %v1522_v20  ;;  %v1526_v34 = vpack.c.bf16 %v883_v31, %v881_v30  ;;  %v607_v35 = vld [vmem:[#allocation5 + $0x50] sm:$0xff]  ;;  %v880_v36 = vld [vmem:[#allocation7 + $0x20] sm:$0xff]  ;;  %v610_v39 = vld [vmem:[#allocation5 + $0x68] sm:$0xff]  ;;  %p1950_p3 = pneg %p1949_p1  ;;  %p1955_p9 = scmp.lt.s32.totalorder %s1953_s30, %s1947_s24 }
  0x77   : > { %276 = vmax.xlane.f32.xlu0 %v2257_v4  ;;  %426 = vmax.xlane.f32.xlu1 %v2262_v5  ;;  %v882_v37 = vld [vmem:[#allocation7 + $0x30] sm:$0xff]  ;;  %v612_v40 = vld [vmem:[#allocation5 + $0x78] sm:$0xff]  ;;  %v885_v41 = vld [vmem:[#allocation7 + $0x48] sm:$0xff]  ;;  %v1468_v43 = vpack.c.bf16 %v607_v35, %v605_v32 }
  0x78   : > { %1525 = vmatpush1.bf16.msra.mxu1 %v1524_v29  ;;  %v1528_v38 = vpack.c.bf16 %v882_v37, %v880_v36  ;;  %v2281_v42 = vld [vmem:[%s2232_s10 + $0x28] sm:$0xff]  ;;  %v611_v48 = vld [vmem:[#allocation5 + $0x70] sm:$0xff]  ;;  %v1470_v51 = vpack.c.bf16 %v612_v40, %v610_v39  ;;  %v889_v52 = vld [vmem:[#allocation7 + $0x68] sm:$0xff]  ;;  %p1956_p12 = por %p1955_p9, %p1954_p7 }
  0x79   : > { %1465 = vmatpush1.bf16.msra.mxu0 %v1464_v24  ;;  %1527 = vmatprep.subr.bf16.mxu1 %v1526_v34  ;;  %v887_v44 = vld [vmem:[#allocation7 + $0x58] sm:$0xff]  ;;  %v609_v45 = vld [vmem:[#allocation5 + $0x60] sm:$0xff]  ;;  %v2286_v46 = vsub.f32 0.0, %v2281_v42  ;;  %v886_v50 = vld [vmem:[#allocation7 + $0x50] sm:$0xff] }
  0x7a   : > { %v1530_v47 = vpack.c.bf16 %v887_v44, %v885_v41  ;;  %v884_v49 = vld [vmem:[#allocation7 + $0x40] sm:$0xff]  ;;  %1467 = vmatprep.subr.bf16.mxu0 %v1466_v33  ;;  %v891_v53 = vld [vmem:[#allocation7 + $0x78] sm:$0xff]  ;;  %v614_v56 = vld [vmem:[#allocation5 + $0x88] sm:$0xff]  ;;  %v1472_v58 = vpack.c.bf16 %v611_v48, %v609_v45  ;;  %p1957_p2 = pnand %p1956_p12, %p1950_p3 }
  0x7b   : > { %278 = vmax.xlane.f32.xlu0 %v2265_v6  ;;  %428 = vmax.xlane.f32.xlu1 %v2270_v9  ;;  %v2289_v54 = vld [vmem:[%s2232_s10 + $0x30] sm:$0xff]  ;;  %v1532_v55 = vpack.c.bf16 %v886_v50, %v884_v49  ;;  %v616_v57 = vld [vmem:[#allocation5 + $0x98] sm:$0xff]  ;;  %v1534_v59 = vpack.c.bf16 %v891_v53, %v889_v52  ;;  %v890_v62 = vld [vmem:[#allocation7 + $0x70] sm:$0xff] }
  0x7c   : > { %1529 = vmatpush1.bf16.msra.mxu1 %v1528_v38  ;;  %v613_v60 = vld [vmem:[#allocation5 + $0x80] sm:$0xff]  ;;  %v2294_v63 = vsub.f32 0.0, %v2289_v54  ;;  %v615_v7 = vld [vmem:[#allocation5 + $0x90] sm:$0xff]  ;;  %v893_v8 = vld [vmem:[#allocation7 + $0x88] sm:$0xff]  ;;  %v1474_v11 = vpack.c.bf16 %v616_v57, %v614_v56 }
  0x7d   : > { %1469 = vmatpush1.bf16.msra.mxu0 %v1468_v43  ;;  %1531 = vmatprep.subr.bf16.mxu1 %v1530_v47  ;;  %v888_v61 = vld [vmem:[#allocation7 + $0x60] sm:$0xff]  ;;  %v895_v10 = vld [vmem:[#allocation7 + $0x98] sm:$0xff]  ;;  %v2297_v12 = vld [vmem:[%s2232_s10 + $0x38] sm:$0xff]  ;;  %v1476_v17 = vpack.c.bf16 %v615_v7, %v613_v60 }
  0x7e   : > { %1471 = vmatprep.subr.bf16.mxu0 %v1470_v51  ;;  %v1536_v13 = vpack.c.bf16 %v890_v62, %v888_v61  ;;  %v618_v15 = vld [vmem:[#allocation5 + $0xa8] sm:$0xff]  ;;  %v620_v16 = vld [vmem:[#allocation5 + $0xb8] sm:$0xff]  ;;  %v1538_v18 = vpack.c.bf16 %v895_v10, %v893_v8  ;;  %v617_v19 = vld [vmem:[#allocation5 + $0xa0] sm:$0xff]  ;;  %v2302_v22 = vsub.f32 0.0, %v2297_v12 }
  0x7f   : > { %280 = vmax.xlane.f32.xlu0 %v2273_v14  ;;  %430 = vmax.xlane.f32.xlu1 %v2278_v28  ;;  %v892_v20 = vld [vmem:[#allocation7 + $0x80] sm:$0xff]  ;;  %v894_v21 = vld [vmem:[#allocation7 + $0x90] sm:$0xff]  ;;  %v897_v24 = vld [vmem:[#allocation7 + $0xa8] sm:$0xff]  ;;  %v1478_v26 = vpack.c.bf16 %v620_v16, %v618_v15 }
  0x80   : > { %1533 = vmatpush1.bf16.msra.mxu1 %v1532_v55  ;;  %v619_v23 = vld [vmem:[#allocation5 + $0xb0] sm:$0xff]  ;;  %v899_v25 = vld [vmem:[#allocation7 + $0xb8] sm:$0xff]  ;;  %v1540_v29 = vpack.c.bf16 %v894_v21, %v892_v20  ;;  %v622_v30 = vld [vmem:[#allocation5 + $0xc8] sm:$0xff] }
  0x81   : > { %1473 = vmatpush1.bf16.msra.mxu0 %v1472_v58  ;;  %1535 = vmatprep.subr.bf16.mxu1 %v1534_v59  ;;  %v2305_v27 = vld [vmem:[%s2232_s10 + $0x40] sm:$0xff]  ;;  %v1480_v32 = vpack.c.bf16 %v619_v23, %v617_v19  ;;  %v1542_v33 = vpack.c.bf16 %v899_v25, %v897_v24  ;;  %v621_v34 = vld [vmem:[#allocation5 + $0xc0] sm:$0xff]  ;;  %v901_v39 = vld [vmem:[#allocation7 + $0xc8] sm:$0xff] }
  0x82   : > { %1475 = vmatprep.subr.bf16.mxu0 %v1474_v11  ;;  %v624_v31 = vld [vmem:[#allocation5 + $0xd8] sm:$0xff]  ;;  %v896_v35 = vld [vmem:[#allocation7 + $0xa0] sm:$0xff]  ;;  %v898_v36 = vld [vmem:[#allocation7 + $0xb0] sm:$0xff]  ;;  %v2310_v37 = vsub.f32 0.0, %v2305_v27 }
  0x83   : > { %282 = vmax.xlane.f32.xlu0 %v2281_v42  ;;  %432 = vmax.xlane.f32.xlu1 %v2286_v46  ;;  %v623_v38 = vld [vmem:[#allocation5 + $0xd0] sm:$0xff]  ;;  %v903_v40 = vld [vmem:[#allocation7 + $0xd8] sm:$0xff]  ;;  %v1482_v41 = vpack.c.bf16 %v624_v31, %v622_v30  ;;  %v1544_v44 = vpack.c.bf16 %v898_v36, %v896_v35  ;;  %v626_v45 = vld [vmem:[#allocation5 + $0xe8] sm:$0xff] }
  0x84   : > { %1537 = vmatpush1.bf16.msra.mxu1 %v1536_v13  ;;  %v2313_v43 = vld [vmem:[%s2232_s10 + $0x48] sm:$0xff]  ;;  %v1484_v48 = vpack.c.bf16 %v623_v38, %v621_v34  ;;  %v1546_v49 = vpack.c.bf16 %v903_v40, %v901_v39  ;;  %v902_v52 = vld [vmem:[#allocation7 + $0xd0] sm:$0xff]  ;;  %v905_v56 = vld [vmem:[#allocation7 + $0xe8] sm:$0xff] }
  0x85   : > { %1477 = vmatpush1.bf16.msra.mxu0 %v1476_v17  ;;  %1539 = vmatprep.subr.bf16.mxu1 %v1538_v18  ;;  %v628_v47 = vld [vmem:[#allocation5 + $0xf8] sm:$0xff]  ;;  %v625_v50 = vld [vmem:[#allocation5 + $0xe0] sm:$0xff]  ;;  %v2318_v53 = vsub.f32 0.0, %v2313_v43  ;;  %v627_v55 = vld [vmem:[#allocation5 + $0xf0] sm:$0xff] }
  0x86   : > { %1479 = vmatprep.subr.bf16.mxu0 %v1478_v26  ;;  %v900_v51 = vld [vmem:[#allocation7 + $0xc0] sm:$0xff]  ;;  %v907_v57 = vld [vmem:[#allocation7 + $0xf8] sm:$0xff]  ;;  %v1486_v58 = vpack.c.bf16 %v628_v47, %v626_v45  ;;  %v630_v61 = vld [vmem:[#allocation5 + $0x108] sm:$0xff]  ;;  %v1488_v7 = vpack.c.bf16 %v627_v55, %v625_v50 }
  0x87   : > { %284 = vmax.xlane.f32.xlu0 %v2289_v54  ;;  %434 = vmax.xlane.f32.xlu1 %v2294_v63  ;;  %v2321_v59 = vld [vmem:[%s2232_s10 + $0x50] sm:$0xff]  ;;  %v1548_v60 = vpack.c.bf16 %v902_v52, %v900_v51  ;;  %v632_v62 = vld [vmem:[#allocation5 + $0x118] sm:$0xff]  ;;  %v1550_v8 = vpack.c.bf16 %v907_v57, %v905_v56  ;;  %v906_v13 = vld [vmem:[#allocation7 + $0xf0] sm:$0xff] }
  0x88   : > { %1541 = vmatpush1.bf16.msra.mxu1 %v1540_v29  ;;  %v629_v10 = vld [vmem:[#allocation5 + $0x100] sm:$0xff]  ;;  %v2326_v15 = vsub.f32 0.0, %v2321_v59  ;;  %v631_v16 = vld [vmem:[#allocation5 + $0x110] sm:$0xff]  ;;  %v909_v17 = vld [vmem:[#allocation7 + $0x108] sm:$0xff]  ;;  %v1490_v19 = vpack.c.bf16 %v632_v62, %v630_v61 }
  0x89   : > { %1481 = vmatpush1.bf16.msra.mxu0 %v1480_v32  ;;  %1543 = vmatprep.subr.bf16.mxu1 %v1542_v33  ;;  %v904_v11 = vld [vmem:[#allocation7 + $0xe0] sm:$0xff]  ;;  %v911_v18 = vld [vmem:[#allocation7 + $0x118] sm:$0xff]  ;;  %v2329_v20 = vld [vmem:[%s2232_s10 + $0x58] sm:$0xff]  ;;  %v1492_v25 = vpack.c.bf16 %v631_v16, %v629_v10 }
  0x8a   : > { %1483 = vmatprep.subr.bf16.mxu0 %v1482_v41  ;;  %v1552_v21 = vpack.c.bf16 %v906_v13, %v904_v11  ;;  %v634_v23 = vld [vmem:[#allocation5 + $0x128] sm:$0xff]  ;;  %v636_v24 = vld [vmem:[#allocation5 + $0x138] sm:$0xff]  ;;  %v1554_v26 = vpack.c.bf16 %v911_v18, %v909_v17  ;;  %v633_v29 = vld [vmem:[#allocation5 + $0x120] sm:$0xff]  ;;  %v2334_v32 = vsub.f32 0.0, %v2329_v20 }
  0x8b   : > { %286 = vmax.xlane.f32.xlu0 %v2297_v12  ;;  %436 = vmax.xlane.f32.xlu1 %v2302_v22  ;;  %v908_v30 = vld [vmem:[#allocation7 + $0x100] sm:$0xff]  ;;  %v910_v31 = vld [vmem:[#allocation7 + $0x110] sm:$0xff]  ;;  %v913_v34 = vld [vmem:[#allocation7 + $0x128] sm:$0xff]  ;;  %v1494_v36 = vpack.c.bf16 %v636_v24, %v634_v23 }
  0x8c   : > { %1545 = vmatpush1.bf16.msra.mxu1 %v1544_v44  ;;  %v635_v33 = vld [vmem:[#allocation5 + $0x130] sm:$0xff]  ;;  %v915_v35 = vld [vmem:[#allocation7 + $0x138] sm:$0xff]  ;;  %v1556_v39 = vpack.c.bf16 %v910_v31, %v908_v30  ;;  %v638_v40 = vld [vmem:[#allocation5 + $0x148] sm:$0xff] }
  0x8d   : > { %1485 = vmatpush1.bf16.msra.mxu0 %v1484_v48  ;;  %1547 = vmatprep.subr.bf16.mxu1 %v1546_v49  ;;  %v2337_v38 = vld [vmem:[%s2232_s10 + $0x60] sm:$0xff]  ;;  %v1496_v44 = vpack.c.bf16 %v635_v33, %v633_v29  ;;  %v1558_v45 = vpack.c.bf16 %v915_v35, %v913_v34  ;;  %v637_v47 = vld [vmem:[#allocation5 + $0x140] sm:$0xff]  ;;  %v917_v52 = vld [vmem:[#allocation7 + $0x148] sm:$0xff] }
  0x8e   : > { %1487 = vmatprep.subr.bf16.mxu0 %v1486_v58  ;;  %v640_v41 = vld [vmem:[#allocation5 + $0x158] sm:$0xff]  ;;  %v912_v48 = vld [vmem:[#allocation7 + $0x120] sm:$0xff]  ;;  %v914_v49 = vld [vmem:[#allocation7 + $0x130] sm:$0xff]  ;;  %v2342_v50 = vsub.f32 0.0, %v2337_v38 }
  0x8f   : > { %288 = vmax.xlane.f32.xlu0 %v2305_v27  ;;  %438 = vmax.xlane.f32.xlu1 %v2310_v37  ;;  %v639_v51 = vld [vmem:[#allocation5 + $0x150] sm:$0xff]  ;;  %v919_v55 = vld [vmem:[#allocation7 + $0x158] sm:$0xff]  ;;  %v1498_v56 = vpack.c.bf16 %v640_v41, %v638_v40  ;;  %v1560_v58 = vpack.c.bf16 %v914_v49, %v912_v48  ;;  %v916_v10 = vld [vmem:[#allocation7 + $0x140] sm:$0xff] }
  0x90   : > { %1549 = vmatpush1.bf16.msra.mxu1 %v1548_v60  ;;  %v2345_v57 = vld [vmem:[%s2232_s10 + $0x68] sm:$0xff]  ;;  %v642_v60 = vld [vmem:[#allocation5 + $0x168] sm:$0xff]  ;;  %v1500_v62 = vpack.c.bf16 %v639_v51, %v637_v47  ;;  %v918_v11 = vld [vmem:[#allocation7 + $0x150] sm:$0xff] }
  0x91   : > { %1489 = vmatpush1.bf16.msra.mxu0 %v1488_v7  ;;  %1551 = vmatprep.subr.bf16.mxu1 %v1550_v8  ;;  %v644_v61 = vld [vmem:[#allocation5 + $0x178] sm:$0xff]  ;;  %v1562_v7 = vpack.c.bf16 %v919_v55, %v917_v52  ;;  %v641_v8 = vld [vmem:[#allocation5 + $0x160] sm:$0xff]  ;;  %v2350_v13 = vsub.f32 0.0, %v2345_v57  ;;  %v643_v16 = vld [vmem:[#allocation5 + $0x170] sm:$0xff]  ;;  %v1564_v23 = vpack.c.bf16 %v918_v11, %v916_v10 }
  0x92   : > { %1491 = vmatprep.subr.bf16.mxu0 %v1490_v19  ;;  %v921_v17 = vld [vmem:[#allocation7 + $0x168] sm:$0xff]  ;;  %v923_v18 = vld [vmem:[#allocation7 + $0x178] sm:$0xff]  ;;  %v1502_v19 = vpack.c.bf16 %v644_v61, %v642_v60  ;;  %v645_v30 = vld [vmem:[#allocation5 + $0x180] sm:$0xff] }
  0x93   : > { %290 = vmax.xlane.f32.xlu0 %v2313_v43  ;;  %440 = vmax.xlane.f32.xlu1 %v2318_v53  ;;  %v646_v24 = vld [vmem:[#allocation5 + $0x188] sm:$0xff]  ;;  %v1566_v29 = vpack.c.bf16 %v923_v18, %v921_v17  ;;  %v920_v31 = vld [vmem:[#allocation7 + $0x160] sm:$0xff]  ;;  %v922_v33 = vld [vmem:[#allocation7 + $0x170] sm:$0xff] }
  0x94   : > { %1553 = vmatpush1.bf16.msra.mxu1 %v1552_v21  ;;  %v2353_v21 = vld [vmem:[%s2232_s10 + $0x70] sm:$0xff]  ;;  %v647_v35 = vld [vmem:[#allocation5 + $0x190] sm:$0xff]  ;;  %v652_v47 = vld [vmem:[#allocation5 + $0x1b8] sm:$0xff] }
  0x95   : > { %1493 = vmatpush1.bf16.msra.mxu0 %v1492_v25  ;;  %1555 = vmatprep.subr.bf16.mxu1 %v1554_v26  ;;  %v648_v25 = vld [vmem:[#allocation5 + $0x198] sm:$0xff]  ;;  %v1504_v26 = vpack.c.bf16 %v643_v16, %v641_v8  ;;  %v2358_v34 = vsub.f32 0.0, %v2353_v21  ;;  %v2361_v41 = vld [vmem:[%s2232_s10 + $0x78] sm:$0xff]  ;;  %v1508_v48 = vpack.c.bf16 %v647_v35, %v645_v30  ;;  %v649_v51 = vld [vmem:[#allocation5 + $0x1a0] sm:$0xff] }
  0x96   : > { %1495 = vmatprep.subr.bf16.mxu0 %v1494_v36  ;;  %v925_v36 = vld [vmem:[#allocation7 + $0x188] sm:$0xff]  ;;  %v1506_v40 = vpack.c.bf16 %v648_v25, %v646_v24  ;;  %v924_v52 = vld [vmem:[#allocation7 + $0x180] sm:$0xff]  ;;  %v926_v55 = vld [vmem:[#allocation7 + $0x190] sm:$0xff] }
  0x97   : > { %292 = vmax.xlane.f32.xlu0 %v2321_v59  ;;  %442 = vmax.xlane.f32.xlu1 %v2326_v15  ;;  %v929_v60 = vld [vmem:[#allocation7 + $0x1a8] sm:$0xff]  ;;  %v931_v61 = vld [vmem:[#allocation7 + $0x1b8] sm:$0xff]  ;;  %v1572_v8 = vpack.c.bf16 %v926_v55, %v924_v52  ;;  %v653_v18 = vld [vmem:[#allocation5 + $0x1c0] sm:$0xff] }
  0x98   : > { %1557 = vmatpush1.bf16.msra.mxu1 %v1556_v39  ;;  %v927_v39 = vld [vmem:[#allocation7 + $0x198] sm:$0xff]  ;;  %v654_v10 = vld [vmem:[#allocation5 + $0x1c8] sm:$0xff]  ;;  %v1574_v17 = vpack.c.bf16 %v931_v61, %v929_v60  ;;  %v655_v25 = vld [vmem:[#allocation5 + $0x1d0] sm:$0xff] }
  0x99   : > { %1497 = vmatpush1.bf16.msra.mxu0 %v1496_v44  ;;  %1559 = vmatprep.subr.bf16.mxu1 %v1558_v45  ;;  %v1568_v44 = vpack.c.bf16 %v922_v33, %v920_v31  ;;  %v650_v45 = vld [vmem:[#allocation5 + $0x1a8] sm:$0xff]  ;;  %v1570_v49 = vpack.c.bf16 %v927_v39, %v925_v36  ;;  %v656_v11 = vld [vmem:[#allocation5 + $0x1d8] sm:$0xff]  ;;  %v1516_v39 = vpack.c.bf16 %v655_v25, %v653_v18 }
  0x9a   : > { %1499 = vmatprep.subr.bf16.mxu0 %v1498_v56  ;;  %v2366_v56 = vsub.f32 0.0, %v2361_v41  ;;  %v1514_v30 = vpack.c.bf16 %v656_v11, %v654_v10  ;;  %v2377_v31 = vld [vmem:[%s2232_s10 + $0x88] sm:$0xff]  ;;  %v658_v35 = vld [vmem:[#allocation5 + $0x1e8] sm:$0xff]  ;;  %v938_v10 = vld [vmem:[#allocation7 + $0x1f0] sm:$0xff] }
  0x9b   : > { %294 = vmax.xlane.f32.xlu0 %v2329_v20  ;;  %444 = vmax.xlane.f32.xlu1 %v2334_v32  ;;  %v660_v36 = vld [vmem:[#allocation5 + $0x1f8] sm:$0xff]  ;;  %v2385_v60 = vld [vmem:[%s2232_s10 + $0x90] sm:$0xff] }
  0x9c   : > { %1561 = vmatpush1.bf16.msra.mxu1 %v1560_v58  ;;  %v651_v58 = vld [vmem:[#allocation5 + $0x1b0] sm:$0xff]  ;;  %v939_v52 = vld [vmem:[#allocation7 + $0x1f8] sm:$0xff]  ;;  %v1518_v55 = vpack.c.bf16 %v660_v36, %v658_v35  ;;  %v2390_v11 = vsub.f32 0.0, %v2385_v60 }
  0x9d   : > { %1501 = vmatpush1.bf16.msra.mxu0 %v1500_v62  ;;  %1563 = vmatprep.subr.bf16.mxu1 %v1562_v7  ;;  %v1510_v62 = vpack.c.bf16 %v652_v47, %v650_v45  ;;  %v2369_v7 = vld [vmem:[%s2232_s10 + $0x80] sm:$0xff]  ;;  %v1512_v16 = vpack.c.bf16 %v651_v58, %v649_v51  ;;  %v932_v45 = vld [vmem:[#allocation7 + $0x1c0] sm:$0xff]  ;;  %v937_v51 = vld [vmem:[#allocation7 + $0x1e8] sm:$0xff] }
  0x9e   : > { %1503 = vmatprep.subr.bf16.mxu0 %v1502_v19  ;;  %v928_v19 = vld [vmem:[#allocation7 + $0x1a0] sm:$0xff]  ;;  %v2374_v24 = vsub.f32 0.0, %v2369_v7  ;;  %v934_v47 = vld [vmem:[#allocation7 + $0x1d0] sm:$0xff] }
  0x9f   : > { %296 = vmax.xlane.f32.xlu0 %v2337_v38  ;;  %446 = vmax.xlane.f32.xlu1 %v2342_v50  ;;  %v1580_v58 = vpack.c.bf16 %v934_v47, %v932_v45  ;;  %v2409_v25 = vld [vmem:[%s2232_s10 + $0xa8] sm:$0xff]  ;;  %v2433_v36 = vld [vmem:[%s2232_s10 + $0xc0] sm:$0xff] }
  0xa0   : > { %1565 = vmatpush1.bf16.msra.mxu1 %v1564_v23  ;;  %v930_v23 = vld [vmem:[#allocation7 + $0x1b0] sm:$0xff]  ;;  %2677 = vst [vmem:[#allocation13_spill] sm:$0xff] %v2433_v36 }
  0xa1   : > { %1505 = vmatpush1.bf16.msra.mxu0 %v1504_v26  ;;  %1567 = vmatprep.subr.bf16.mxu1 %v1566_v29  ;;  %v933_v26 = vld [vmem:[#allocation7 + $0x1c8] sm:$0xff]  ;;  %v935_v29 = vld [vmem:[#allocation7 + $0x1d8] sm:$0xff]  ;;  %v1576_v33 = vpack.c.bf16 %v930_v23, %v928_v19 }
  0xa2   : > { %1507 = vmatprep.subr.bf16.mxu0 %v1506_v40  ;;  %v1578_v40 = vpack.c.bf16 %v935_v29, %v933_v26  ;;  %v2401_v19 = vld [vmem:[%s2232_s10 + $0xa0] sm:$0xff]  ;;  %v2414_v26 = vsub.f32 0.0, %v2409_v25  ;;  %v2417_v29 = vld [vmem:[%s2232_s10 + $0xb0] sm:$0xff] }
  0xa3   : > { %298 = vmax.xlane.f32.xlu0 %v2345_v57  ;;  %448 = vmax.xlane.f32.xlu1 %v2350_v13  ;;  %v2406_v23 = vsub.f32 0.0, %v2401_v19 }
  0xa4   : > { %1569 = vmatpush1.bf16.msra.mxu1 %v1568_v44  ;;  %v657_v44 = vld [vmem:[#allocation5 + $0x1e0] sm:$0xff] }
  0xa5   : > { %1509 = vmatpush1.bf16.msra.mxu0 %v1508_v48  ;;  %1571 = vmatprep.subr.bf16.mxu1 %v1570_v49  ;;  %v2382_v48 = vsub.f32 0.0, %v2377_v31  ;;  %v659_v49 = vld [vmem:[#allocation5 + $0x1f0] sm:$0xff] }
  0xa6   : > { %1511 = vmatprep.subr.bf16.mxu0 %v1510_v62  ;;  %v1520_v61 = vpack.c.bf16 %v659_v49, %v657_v44  ;;  %v1582_v62 = vpack.c.bf16 %v939_v52, %v937_v51 }
  0xa7   : > { %300 = vmax.xlane.f32.xlu0 %v2353_v21  ;;  %450 = vmax.xlane.f32.xlu1 %v2358_v34 }
  0xa8   : > { %1573 = vmatpush1.bf16.msra.mxu1 %v1572_v8  ;;  %v936_v8 = vld [vmem:[#allocation7 + $0x1e0] sm:$0xff] }
  0xa9   : > { %1513 = vmatpush1.bf16.msra.mxu0 %v1512_v16  ;;  %1575 = vmatprep.subr.bf16.mxu1 %v1574_v17  ;;  %v1584_v16 = vpack.c.bf16 %v938_v10, %v936_v8  ;;  %v2393_v17 = vld [vmem:[%s2232_s10 + $0x98] sm:$0xff] }
  0xaa   : > { %1515 = vmatprep.subr.bf16.mxu0 %v1514_v30  ;;  %v2398_v18 = vsub.f32 0.0, %v2393_v17  ;;  %v2422_v30 = vsub.f32 0.0, %v2417_v29 }
  0xab   : > { %302 = vmax.xlane.f32.xlu0 %v2361_v41  ;;  %452 = vmax.xlane.f32.xlu1 %v2366_v56 }
  0xac   : > { %1577 = vmatpush1.bf16.msra.mxu1 %v1576_v33  ;;  %v2425_v33 = vld [vmem:[%s2232_s10 + $0xb8] sm:$0xff] }
  0xad   : > { %1517 = vmatpush1.bf16.msra.mxu0 %v1516_v39  ;;  %1579 = vmatprep.subr.bf16.mxu1 %v1578_v40  ;;  %v2430_v35 = vsub.f32 0.0, %v2425_v33  ;;  %v2438_v39 = vsub.f32 0.0, %v2433_v36 }
  0xae   : > { %1519 = vmatprep.subr.bf16.mxu0 %v1518_v55 }
  0xaf   : > { %304 = vmax.xlane.f32.xlu0 %v2369_v7  ;;  %454 = vmax.xlane.f32.xlu1 %v2374_v24  ;;  %2676 = vst [vmem:[#allocation12_spill] sm:$0xff] %v2430_v35  ;;  %2678 = vst [vmem:[#allocation14_spill] sm:$0xff] %v2438_v39 }
  0xb0   : > { %1581 = vmatpush1.bf16.msra.mxu1 %v1580_v58 }
  0xb1   : > { %1521 = vmatpush1.bf16.msra.mxu0 %v1520_v61  ;;  %1583 = vmatprep.subr.bf16.mxu1 %v1582_v62 }
  0xb3   : > { %306 = vmax.xlane.f32.xlu0 %v2377_v31  ;;  %456 = vmax.xlane.f32.xlu1 %v2382_v48 }
  0xb4   : > { %1585 = vmatpush1.bf16.msra.mxu1 %v1584_v16 }
  0xb7   : > { %308 = vmax.xlane.f32.xlu0 %v2385_v60  ;;  %458 = vmax.xlane.f32.xlu1 %v2390_v11 }
  0xbb   : > { %310 = vmax.xlane.f32.xlu0 %v2393_v17  ;;  %460 = vmax.xlane.f32.xlu1 %v2398_v18 }
  0xbf   : > { %312 = vmax.xlane.f32.xlu0 %v2401_v19  ;;  %462 = vmax.xlane.f32.xlu1 %v2406_v23 }
  0xc3   : > { %314 = vmax.xlane.f32.xlu0 %v2409_v25  ;;  %464 = vmax.xlane.f32.xlu1 %v2414_v26 }
  0xc7   : > { %316 = vmax.xlane.f32.xlu0 %v2417_v29  ;;  %466 = vmax.xlane.f32.xlu1 %v2422_v30 }
  0xcb   : > { %318 = vmax.xlane.f32.xlu0 %v2425_v33  ;;  %468 = vmax.xlane.f32.xlu1 %v2430_v35 }
  0xcf   : > { %320 = vmax.xlane.f32.xlu0 %v2433_v36  ;;  %470 = vmax.xlane.f32.xlu1 %v2438_v39 }
  0xfc   : > { %v273_v40 = vpop.xlane.xlu0 %272  ;;  %v275_v44 = vpop.xlane.xlu1 %274 }
  0xfd   : > { %v322_v45 = vsub.f32 %v2243_v0, %v273_v40  ;;  %v323_v47 = vsub.f32 %v2246_v1, %v275_v44 }
  0xff   : > { %v347_v49 = vmul.f32 1.442695, %v322_v45  ;;  %v349_v51 = vmul.f32 1.442695, %v323_v47 }
 0x100   : > { %v423_v52 = vpop.xlane.xlu0 %422  ;;  %v425_v55 = vpop.xlane.xlu1 %424 }
 0x101   : > { %1661 = vpow2.f32 %v347_v49  ;;  %v472_v58 = vsub.f32 %v2251_v2, %v423_v52  ;;  %v473_v61 = vsub.f32 %v2254_v3, %v425_v55 }
 0x102   : > { %1663 = vpow2.f32 %v349_v51 }
 0x103   : > { %v497_v62 = vmul.f32 1.442695, %v472_v58  ;;  %v499_v8 = vmul.f32 1.442695, %v473_v61 }
 0x104   : > { %v277_v10 = vpop.xlane.xlu0 %276  ;;  %v427_v16 = vpop.xlane.xlu1 %426 }
 0x105   : > { %1665 = vpow2.f32 %v497_v62  ;;  %v324_v39 = vsub.f32 %v2257_v4, %v277_v10  ;;  %v474_v40 = vsub.f32 %v2262_v5, %v427_v16 }
 0x106   : > { %1667 = vpow2.f32 %v499_v8 }
 0x107   : > { %v351_v44 = vmul.f32 1.442695, %v324_v39  ;;  %v501_v45 = vmul.f32 1.442695, %v474_v40 }
 0x108   : > { %v279_v47 = vpop.xlane.xlu0 %278  ;;  %v429_v36 = vpop.xlane.xlu1 %428 }
 0x109   : > { %1669 = vpow2.f32 %v351_v44  ;;  %v325_v49 = vsub.f32 %v2265_v6, %v279_v47  ;;  %v475_v52 = vsub.f32 %v2270_v9, %v429_v36 }
 0x10a   : > { %1671 = vpow2.f32 %v501_v45 }
 0x10b   : > { %v1662_v51 = vpop.eup %1661  ;;  %v353_v55 = vmul.f32 1.442695, %v325_v49  ;;  %v503_v58 = vmul.f32 1.442695, %v475_v52 }
 0x10c   : > { %v1664_v61 = vpop.eup %1663  ;;  %v281_v62 = vpop.xlane.xlu0 %280  ;;  %v547_v10 = vmul.f32 %v1662_v51, %v2243_v0 }
 0x10d   : > { %v431_v35 = vpop.xlane.xlu1 %430  ;;  %1673 = vpow2.f32 %v353_v55  ;;  %v326_v39 = vsub.f32 %v2273_v14, %v281_v62  ;;  %v548_v16 = vmul.f32 %v1664_v61, %v2246_v1 }
 0x10e   : > { %v476_v8 = vsub.f32 %v2278_v28, %v431_v35  ;;  %1675 = vpow2.f32 %v503_v58  ;;  %725 = vmatprep.mubr.f32.mxu0 %v547_v10 }
 0x10f   : > { %v1666_v40 = vpop.eup %1665  ;;  %v355_v36 = vmul.f32 1.442695, %v326_v39  ;;  %726 = vmatmul.mubr.f32.vlgmr.msra.gmra.mrb[0].mxu0 %v1662_v51 }
 0x110   : > { %v505_v44 = vmul.f32 1.442695, %v476_v8  ;;  %v1668_v45 = vpop.eup %1667  ;;  %v283_v47 = vpop.xlane.xlu0 %282  ;;  %731 = vmatprep.mubr.f32.mxu0 %v548_v16  ;;  %v572_v49 = vmul.f32 %v1666_v40, %v2251_v2 }
 0x111   : > { %v433_v0 = vpop.xlane.xlu1 %432  ;;  %1677 = vpow2.f32 %v355_v36  ;;  %v327_v52 = vsub.f32 %v2281_v42, %v283_v47  ;;  %v573_v35 = vmul.f32 %v1668_v45, %v2254_v3 }
 0x112   : > { %v477_v55 = vsub.f32 %v2286_v46, %v433_v0  ;;  %1679 = vpow2.f32 %v505_v44  ;;  %1004 = vmatprep.mubr.f32.mxu1 %v572_v49 }
 0x113   : > { %v1670_v1 = vpop.eup %1669  ;;  %v357_v58 = vmul.f32 1.442695, %v327_v52  ;;  %732 = vmatmul.mubr.f32.gmra.mrb[2].mxu0 %v1664_v61  ;;  %1005 = vmatmul.mubr.f32.vlgmr.msra.gmra.mrb[0].mxu1 %v1666_v40 }
 0x114   : > { %v507_v51 = vmul.f32 1.442695, %v477_v55  ;;  %v1672_v62 = vpop.eup %1671  ;;  %v285_v10 = vpop.xlane.xlu0 %284  ;;  %v549_v39 = vmul.f32 %v1670_v1, %v2257_v4  ;;  %1010 = vmatprep.mubr.f32.mxu1 %v573_v35 }
 0x115   : > { %v435_v2 = vpop.xlane.xlu1 %434  ;;  %1681 = vpow2.f32 %v357_v58  ;;  %v328_v8 = vsub.f32 %v2289_v54, %v285_v10  ;;  %v574_v3 = vmul.f32 %v1672_v62, %v2262_v5 }
 0x116   : > { %v478_v16 = vsub.f32 %v2294_v63, %v435_v2  ;;  %1683 = vpow2.f32 %v507_v51  ;;  %737 = vmatprep.mubr.f32.mxu0 %v549_v39 }
 0x117   : > { %v1674_v36 = vpop.eup %1673  ;;  %v359_v44 = vmul.f32 1.442695, %v328_v8  ;;  %738 = vmatmul.mubr.f32.gmra.mrb[4].mxu0 %v1670_v1  ;;  %1011 = vmatmul.mubr.f32.gmra.mrb[2].mxu1 %v1668_v45 }
 0x118   : > { %v509_v61 = vmul.f32 1.442695, %v478_v16  ;;  %v1676_v40 = vpop.eup %1675  ;;  %v287_v47 = vpop.xlane.xlu0 %286  ;;  %v550_v4 = vmul.f32 %v1674_v36, %v2265_v6  ;;  %1016 = vmatprep.mubr.f32.mxu1 %v574_v3 }
 0x119   : > { %v437_v49 = vpop.xlane.xlu1 %436  ;;  %1685 = vpow2.f32 %v359_v44  ;;  %v329_v0 = vsub.f32 %v2297_v12, %v287_v47  ;;  %v575_v5 = vmul.f32 %v1676_v40, %v2270_v9 }
 0x11a   : > { %v479_v52 = vsub.f32 %v2302_v22, %v437_v49  ;;  %1687 = vpow2.f32 %v509_v61  ;;  %743 = vmatprep.mubr.f32.mxu0 %v550_v4 }
 0x11b   : > { %v1678_v55 = vpop.eup %1677  ;;  %v361_v35 = vmul.f32 1.442695, %v329_v0  ;;  %744 = vmatmul.mubr.f32.gmra.mrb[6].mxu0 %v1674_v36  ;;  %1017 = vmatmul.mubr.f32.gmra.mrb[4].mxu1 %v1672_v62 }
 0x11c   : > { %v511_v45 = vmul.f32 1.442695, %v479_v52  ;;  %v1680_v1 = vpop.eup %1679  ;;  %v289_v58 = vpop.xlane.xlu0 %288  ;;  %v551_v6 = vmul.f32 %v1678_v55, %v2273_v14  ;;  %1022 = vmatprep.mubr.f32.mxu1 %v575_v5 }
 0x11d   : > { %v439_v51 = vpop.xlane.xlu1 %438  ;;  %1689 = vpow2.f32 %v361_v35  ;;  %v330_v10 = vsub.f32 %v2305_v27, %v289_v58  ;;  %v576_v9 = vmul.f32 %v1680_v1, %v2278_v28 }
 0x11e   : > { %v480_v39 = vsub.f32 %v2310_v37, %v439_v51  ;;  %1691 = vpow2.f32 %v511_v45  ;;  %749 = vmatprep.mubr.f32.mxu0 %v551_v6 }
 0x11f   : > { %v1682_v2 = vpop.eup %1681  ;;  %v363_v8 = vmul.f32 1.442695, %v330_v10  ;;  %750 = vmatmul.mubr.f32.gmra.mrb[8].mxu0 %v1678_v55  ;;  %1023 = vmatmul.mubr.f32.gmra.mrb[6].mxu1 %v1676_v40 }
 0x120   : > { %v513_v62 = vmul.f32 1.442695, %v480_v39  ;;  %v1684_v16 = vpop.eup %1683  ;;  %v291_v3 = vpop.xlane.xlu0 %290  ;;  %v552_v14 = vmul.f32 %v1682_v2, %v2281_v42  ;;  %1028 = vmatprep.mubr.f32.mxu1 %v576_v9 }
 0x121   : > { %v441_v36 = vpop.xlane.xlu1 %440  ;;  %1693 = vpow2.f32 %v363_v8  ;;  %v331_v44 = vsub.f32 %v2313_v43, %v291_v3  ;;  %v577_v28 = vmul.f32 %v1684_v16, %v2286_v46 }
 0x122   : > { %v481_v61 = vsub.f32 %v2318_v53, %v441_v36  ;;  %1695 = vpow2.f32 %v513_v62  ;;  %755 = vmatprep.mubr.f32.mxu0 %v552_v14 }
 0x123   : > { %v1686_v47 = vpop.eup %1685  ;;  %v365_v4 = vmul.f32 1.442695, %v331_v44  ;;  %756 = vmatmul.mubr.f32.gmra.mrb[10].mxu0 %v1682_v2  ;;  %1029 = vmatmul.mubr.f32.gmra.mrb[8].mxu1 %v1680_v1 }
 0x124   : > { %v515_v40 = vmul.f32 1.442695, %v481_v61  ;;  %v1688_v49 = vpop.eup %1687  ;;  %v293_v0 = vpop.xlane.xlu0 %292  ;;  %v553_v42 = vmul.f32 %v1686_v47, %v2289_v54  ;;  %1034 = vmatprep.mubr.f32.mxu1 %v577_v28 }
 0x125   : > { %v443_v52 = vpop.xlane.xlu1 %442  ;;  %1697 = vpow2.f32 %v365_v4  ;;  %v332_v5 = vsub.f32 %v2321_v59, %v293_v0  ;;  %v578_v46 = vmul.f32 %v1688_v49, %v2294_v63 }
 0x126   : > { %v482_v55 = vsub.f32 %v2326_v15, %v443_v52  ;;  %1699 = vpow2.f32 %v515_v40  ;;  %761 = vmatprep.mubr.f32.mxu0 %v553_v42 }
 0x127   : > { %v1690_v35 = vpop.eup %1689  ;;  %v367_v45 = vmul.f32 1.442695, %v332_v5  ;;  %762 = vmatmul.mubr.f32.gmra.mrb[12].mxu0 %v1686_v47  ;;  %1035 = vmatmul.mubr.f32.gmra.mrb[10].mxu1 %v1684_v16 }
 0x128   : > { %v517_v1 = vmul.f32 1.442695, %v482_v55  ;;  %v1692_v58 = vpop.eup %1691  ;;  %v295_v6 = vpop.xlane.xlu0 %294  ;;  %v554_v54 = vmul.f32 %v1690_v35, %v2297_v12  ;;  %1040 = vmatprep.mubr.f32.mxu1 %v578_v46 }
 0x129   : > { %v445_v51 = vpop.xlane.xlu1 %444  ;;  %1701 = vpow2.f32 %v367_v45  ;;  %v333_v10 = vsub.f32 %v2329_v20, %v295_v6  ;;  %v579_v63 = vmul.f32 %v1692_v58, %v2302_v22 }
 0x12a   : > { %v483_v39 = vsub.f32 %v2334_v32, %v445_v51  ;;  %1703 = vpow2.f32 %v517_v1  ;;  %767 = vmatprep.mubr.f32.mxu0 %v554_v54 }
 0x12b   : > { %v1694_v9 = vpop.eup %1693  ;;  %v369_v2 = vmul.f32 1.442695, %v333_v10  ;;  %768 = vmatmul.mubr.f32.gmra.mrb[14].mxu0 %v1690_v35  ;;  %1041 = vmatmul.mubr.f32.gmra.mrb[12].mxu1 %v1688_v49 }
 0x12c   : > { %v519_v8 = vmul.f32 1.442695, %v483_v39  ;;  %v1696_v62 = vpop.eup %1695  ;;  %v297_v16 = vpop.xlane.xlu0 %296  ;;  %v555_v12 = vmul.f32 %v1694_v9, %v2305_v27  ;;  %1046 = vmatprep.mubr.f32.mxu1 %v579_v63 }
 0x12d   : > { %v447_v3 = vpop.xlane.xlu1 %446  ;;  %1705 = vpow2.f32 %v369_v2  ;;  %v334_v14 = vsub.f32 %v2337_v38, %v297_v16  ;;  %v580_v22 = vmul.f32 %v1696_v62, %v2310_v37 }
 0x12e   : > { %v484_v36 = vsub.f32 %v2342_v50, %v447_v3  ;;  %1707 = vpow2.f32 %v519_v8  ;;  %773 = vmatprep.mubr.f32.mxu0 %v555_v12 }
 0x12f   : > { %v1698_v44 = vpop.eup %1697  ;;  %v371_v61 = vmul.f32 1.442695, %v334_v14  ;;  %774 = vmatmul.mubr.f32.gmra.mrb[16].mxu0 %v1694_v9  ;;  %1047 = vmatmul.mubr.f32.gmra.mrb[14].mxu1 %v1692_v58 }
 0x130   : > { %v521_v28 = vmul.f32 1.442695, %v484_v36  ;;  %v1700_v47 = vpop.eup %1699  ;;  %v299_v4 = vpop.xlane.xlu0 %298  ;;  %v556_v27 = vmul.f32 %v1698_v44, %v2313_v43  ;;  %1052 = vmatprep.mubr.f32.mxu1 %v580_v22 }
 0x131   : > { %v449_v40 = vpop.xlane.xlu1 %448  ;;  %1709 = vpow2.f32 %v371_v61  ;;  %v335_v49 = vsub.f32 %v2345_v57, %v299_v4  ;;  %v581_v37 = vmul.f32 %v1700_v47, %v2318_v53 }
 0x132   : > { %v485_v0 = vsub.f32 %v2350_v13, %v449_v40  ;;  %1711 = vpow2.f32 %v521_v28  ;;  %779 = vmatprep.mubr.f32.mxu0 %v556_v27 }
 0x133   : > { %v1702_v42 = vpop.eup %1701  ;;  %v373_v52 = vmul.f32 1.442695, %v335_v49  ;;  %780 = vmatmul.mubr.f32.gmra.mrb[18].mxu0 %v1698_v44  ;;  %1053 = vmatmul.mubr.f32.gmra.mrb[16].mxu1 %v1696_v62 }
 0x134   : > { %v523_v5 = vmul.f32 1.442695, %v485_v0  ;;  %v1704_v55 = vpop.eup %1703  ;;  %v301_v46 = vpop.xlane.xlu0 %300  ;;  %v557_v43 = vmul.f32 %v1702_v42, %v2321_v59  ;;  %1058 = vmatprep.mubr.f32.mxu1 %v581_v37 }
 0x135   : > { %v451_v35 = vpop.xlane.xlu1 %450  ;;  %1713 = vpow2.f32 %v373_v52  ;;  %v336_v45 = vsub.f32 %v2353_v21, %v301_v46  ;;  %v582_v53 = vmul.f32 %v1704_v55, %v2326_v15 }
 0x136   : > { %v486_v1 = vsub.f32 %v2358_v34, %v451_v35  ;;  %1715 = vpow2.f32 %v523_v5  ;;  %785 = vmatprep.mubr.f32.mxu0 %v557_v43 }
 0x137   : > { %v1706_v58 = vpop.eup %1705  ;;  %v375_v6 = vmul.f32 1.442695, %v336_v45  ;;  %786 = vmatmul.mubr.f32.gmra.mrb[20].mxu0 %v1702_v42  ;;  %1059 = vmatmul.mubr.f32.gmra.mrb[18].mxu1 %v1700_v47 }
 0x138   : > { %v525_v54 = vmul.f32 1.442695, %v486_v1  ;;  %v1708_v51 = vpop.eup %1707  ;;  %v303_v10 = vpop.xlane.xlu0 %302  ;;  %v558_v59 = vmul.f32 %v1706_v58, %v2329_v20  ;;  %1064 = vmatprep.mubr.f32.mxu1 %v582_v53 }
 0x139   : > { %v453_v39 = vpop.xlane.xlu1 %452  ;;  %1717 = vpow2.f32 %v375_v6  ;;  %v337_v63 = vsub.f32 %v2361_v41, %v303_v10  ;;  %v583_v15 = vmul.f32 %v1708_v51, %v2334_v32 }
 0x13a   : > { %v487_v9 = vsub.f32 %v2366_v56, %v453_v39  ;;  %1719 = vpow2.f32 %v525_v54  ;;  %791 = vmatprep.mubr.f32.mxu0 %v558_v59 }
 0x13b   : > { %v1710_v2 = vpop.eup %1709  ;;  %v377_v8 = vmul.f32 1.442695, %v337_v63  ;;  %792 = vmatmul.mubr.f32.gmra.mrb[22].mxu0 %v1706_v58  ;;  %1065 = vmatmul.mubr.f32.gmra.mrb[20].mxu1 %v1704_v55 }
 0x13c   : > { %v527_v62 = vmul.f32 1.442695, %v487_v9  ;;  %v1712_v16 = vpop.eup %1711  ;;  %v305_v12 = vpop.xlane.xlu0 %304  ;;  %v559_v20 = vmul.f32 %v1710_v2, %v2337_v38  ;;  %1070 = vmatprep.mubr.f32.mxu1 %v583_v15 }
 0x13d   : > { %v455_v3 = vpop.xlane.xlu1 %454  ;;  %1721 = vpow2.f32 %v377_v8  ;;  %v338_v14 = vsub.f32 %v2369_v7, %v305_v12  ;;  %v584_v32 = vmul.f32 %v1712_v16, %v2342_v50 }
 0x13e   : > { %v488_v36 = vsub.f32 %v2374_v24, %v455_v3  ;;  %1723 = vpow2.f32 %v527_v62  ;;  %797 = vmatprep.mubr.f32.mxu0 %v559_v20 }
 0x13f   : > { %v1714_v22 = vpop.eup %1713  ;;  %v379_v44 = vmul.f32 1.442695, %v338_v14  ;;  %798 = vmatmul.mubr.f32.gmra.mrb[24].mxu0 %v1710_v2  ;;  %1071 = vmatmul.mubr.f32.gmra.mrb[22].mxu1 %v1708_v51 }
 0x140   : > { %v529_v61 = vmul.f32 1.442695, %v488_v36  ;;  %v1716_v28 = vpop.eup %1715  ;;  %v307_v47 = vpop.xlane.xlu0 %306  ;;  %v560_v38 = vmul.f32 %v1714_v22, %v2345_v57  ;;  %1076 = vmatprep.mubr.f32.mxu1 %v584_v32 }
 0x141   : > { %v457_v4 = vpop.xlane.xlu1 %456  ;;  %1725 = vpow2.f32 %v379_v44  ;;  %v339_v27 = vsub.f32 %v2377_v31, %v307_v47  ;;  %v585_v50 = vmul.f32 %v1716_v28, %v2350_v13 }
 0x142   : > { %v489_v40 = vsub.f32 %v2382_v48, %v457_v4  ;;  %1727 = vpow2.f32 %v529_v61  ;;  %803 = vmatprep.mubr.f32.mxu0 %v560_v38 }
 0x143   : > { %v1718_v49 = vpop.eup %1717  ;;  %v381_v0 = vmul.f32 1.442695, %v339_v27  ;;  %804 = vmatmul.mubr.f32.gmra.mrb[26].mxu0 %v1714_v22  ;;  %1077 = vmatmul.mubr.f32.gmra.mrb[24].mxu1 %v1712_v16 }
 0x144   : > { %v531_v37 = vmul.f32 1.442695, %v489_v40  ;;  %v1720_v42 = vpop.eup %1719  ;;  %v309_v52 = vpop.xlane.xlu0 %308  ;;  %v561_v57 = vmul.f32 %v1718_v49, %v2353_v21  ;;  %1082 = vmatprep.mubr.f32.mxu1 %v585_v50 }
 0x145   : > { %v459_v5 = vpop.xlane.xlu1 %458  ;;  %1729 = vpow2.f32 %v381_v0  ;;  %v340_v55 = vsub.f32 %v2385_v60, %v309_v52  ;;  %v586_v13 = vmul.f32 %v1720_v42, %v2358_v34  ;;  %v2679_v52 = vld [vmem:[#allocation12_spill] sm:$0xff] }
 0x146   : > { %v490_v46 = vsub.f32 %v2390_v11, %v459_v5  ;;  %1731 = vpow2.f32 %v531_v37  ;;  %809 = vmatprep.mubr.f32.mxu0 %v561_v57 }
 0x147   : > { %v1722_v43 = vpop.eup %1721  ;;  %v383_v35 = vmul.f32 1.442695, %v340_v55  ;;  %810 = vmatmul.mubr.f32.gmra.mrb[28].mxu0 %v1718_v49  ;;  %1083 = vmatmul.mubr.f32.gmra.mrb[26].mxu1 %v1716_v28 }
 0x148   : > { %v533_v45 = vmul.f32 1.442695, %v490_v46  ;;  %v1724_v1 = vpop.eup %1723  ;;  %v311_v53 = vpop.xlane.xlu0 %310  ;;  %v562_v21 = vmul.f32 %v1722_v43, %v2361_v41  ;;  %1088 = vmatprep.mubr.f32.mxu1 %v586_v13 }
 0x149   : > { %v461_v58 = vpop.xlane.xlu1 %460  ;;  %1733 = vpow2.f32 %v383_v35  ;;  %v341_v6 = vsub.f32 %v2393_v17, %v311_v53  ;;  %v587_v34 = vmul.f32 %v1724_v1, %v2366_v56  ;;  %v2681_v53 = vld [vmem:[#allocation14_spill] sm:$0xff] }
 0x14a   : > { %v491_v54 = vsub.f32 %v2398_v18, %v461_v58  ;;  %1735 = vpow2.f32 %v533_v45  ;;  %815 = vmatprep.mubr.f32.mxu0 %v562_v21  ;;  %v2680_v45 = vld [vmem:[#allocation13_spill] sm:$0xff] }
 0x14b   : > { %v1726_v51 = vpop.eup %1725  ;;  %v385_v10 = vmul.f32 1.442695, %v341_v6  ;;  %816 = vmatmul.mubr.f32.gmra.mrb[30].mxu0 %v1722_v43  ;;  %1089 = vmatmul.mubr.f32.gmra.mrb[28].mxu1 %v1720_v42 }
 0x14c   : > { %v535_v59 = vmul.f32 1.442695, %v491_v54  ;;  %v1728_v39 = vpop.eup %1727  ;;  %v313_v63 = vpop.xlane.xlu0 %312  ;;  %v563_v41 = vmul.f32 %v1726_v51, %v2369_v7  ;;  %1094 = vmatprep.mubr.f32.mxu1 %v587_v34 }
 0x14d   : > { %v463_v9 = vpop.xlane.xlu1 %462  ;;  %1737 = vpow2.f32 %v385_v10  ;;  %v342_v15 = vsub.f32 %v2401_v19, %v313_v63  ;;  %v588_v56 = vmul.f32 %v1728_v39, %v2374_v24 }
 0x14e   : > { %v492_v2 = vsub.f32 %v2406_v23, %v463_v9  ;;  %1739 = vpow2.f32 %v535_v59  ;;  %821 = vmatprep.mubr.f32.mxu0 %v563_v41 }
 0x14f   : > { %v1730_v8 = vpop.eup %1729  ;;  %v387_v62 = vmul.f32 1.442695, %v342_v15  ;;  %822 = vmatmul.mubr.f32.gmra.mrb[32].mxu0 %v1726_v51  ;;  %1095 = vmatmul.mubr.f32.gmra.mrb[30].mxu1 %v1724_v1 }
 0x150   : > { %v537_v16 = vmul.f32 1.442695, %v492_v2  ;;  %v1732_v12 = vpop.eup %1731  ;;  %v315_v20 = vpop.xlane.xlu0 %314  ;;  %v564_v7 = vmul.f32 %v1730_v8, %v2377_v31  ;;  %1100 = vmatprep.mubr.f32.mxu1 %v588_v56 }
 0x151   : > { %v465_v3 = vpop.xlane.xlu1 %464  ;;  %1741 = vpow2.f32 %v387_v62  ;;  %v343_v14 = vsub.f32 %v2409_v25, %v315_v20  ;;  %v589_v24 = vmul.f32 %v1732_v12, %v2382_v48 }
 0x152   : > { %v493_v36 = vsub.f32 %v2414_v26, %v465_v3  ;;  %1743 = vpow2.f32 %v537_v16  ;;  %827 = vmatprep.mubr.f32.mxu0 %v564_v7 }
 0x153   : > { %v1734_v32 = vpop.eup %1733  ;;  %v389_v22 = vmul.f32 1.442695, %v343_v14  ;;  %828 = vmatmul.mubr.f32.gmra.mrb[34].mxu0 %v1730_v8  ;;  %1101 = vmatmul.mubr.f32.gmra.mrb[32].mxu1 %v1728_v39 }
 0x154   : > { %v539_v44 = vmul.f32 1.442695, %v493_v36  ;;  %v1736_v61 = vpop.eup %1735  ;;  %v317_v28 = vpop.xlane.xlu0 %316  ;;  %v565_v31 = vmul.f32 %v1734_v32, %v2385_v60  ;;  %1106 = vmatprep.mubr.f32.mxu1 %v589_v24 }
 0x155   : > { %v467_v47 = vpop.xlane.xlu1 %466  ;;  %1745 = vpow2.f32 %v389_v22  ;;  %v344_v38 = vsub.f32 %v2417_v29, %v317_v28  ;;  %v590_v48 = vmul.f32 %v1736_v61, %v2390_v11 }
 0x156   : > { %v494_v4 = vsub.f32 %v2422_v30, %v467_v47  ;;  %1747 = vpow2.f32 %v539_v44  ;;  %833 = vmatprep.mubr.f32.mxu0 %v565_v31 }
 0x157   : > { %v1738_v27 = vpop.eup %1737  ;;  %v391_v40 = vmul.f32 1.442695, %v344_v38  ;;  %834 = vmatmul.mubr.f32.gmra.mrb[36].mxu0 %v1734_v32  ;;  %1107 = vmatmul.mubr.f32.gmra.mrb[34].mxu1 %v1732_v12 }
 0x158   : > { %v541_v50 = vmul.f32 1.442695, %v494_v4  ;;  %v1740_v49 = vpop.eup %1739  ;;  %v319_v0 = vpop.xlane.xlu0 %318  ;;  %v566_v60 = vmul.f32 %v1738_v27, %v2393_v17  ;;  %1112 = vmatprep.mubr.f32.mxu1 %v590_v48 }
 0x159   : > { %v469_v37 = vpop.xlane.xlu1 %468  ;;  %1749 = vpow2.f32 %v391_v40  ;;  %v345_v42 = vsub.f32 %v2425_v33, %v319_v0  ;;  %v591_v11 = vmul.f32 %v1740_v49, %v2398_v18  ;;  %v2545_v40 = vld [vmem:[%s2655_s3] ss:$0 sm:$0xff] }
 0x15a   : > { %v495_v57 = vsub.f32 %v2679_v52, %v469_v37  ;;  %1751 = vpow2.f32 %v541_v50  ;;  %839 = vmatprep.mubr.f32.mxu0 %v566_v60 }
 0x15b   : > { %v1742_v5 = vpop.eup %1741  ;;  %v393_v55 = vmul.f32 1.442695, %v345_v42  ;;  %840 = vmatmul.mubr.f32.gmra.mrb[38].mxu0 %v1738_v27  ;;  %1113 = vmatmul.mubr.f32.gmra.mrb[36].mxu1 %v1736_v61 }
 0x15c   : > { %v543_v46 = vmul.f32 1.442695, %v495_v57  ;;  %v1744_v13 = vpop.eup %1743  ;;  %v321_v43 = vpop.xlane.xlu0 %320  ;;  %v567_v17 = vmul.f32 %v1742_v5, %v2401_v19  ;;  %1118 = vmatprep.mubr.f32.mxu1 %v591_v11 }
 0x15d   : > { %v471_v35 = vpop.xlane.xlu1 %470  ;;  %1753 = vpow2.f32 %v393_v55  ;;  %v346_v1 = vsub.f32 %v2680_v45, %v321_v43  ;;  %v592_v18 = vmul.f32 %v1744_v13, %v2406_v23 }
 0x15e   : > { %v496_v21 = vsub.f32 %v2681_v53, %v471_v35  ;;  %1755 = vpow2.f32 %v543_v46  ;;  %845 = vmatprep.mubr.f32.mxu0 %v567_v17 }
 0x15f   : > { %v1746_v58 = vpop.eup %1745  ;;  %v395_v6 = vmul.f32 1.442695, %v346_v1  ;;  %846 = vmatmul.mubr.f32.gmra.mrb[40].mxu0 %v1742_v5  ;;  %1119 = vmatmul.mubr.f32.gmra.mrb[38].mxu1 %v1740_v49 }
 0x160   : > { %v545_v54 = vmul.f32 1.442695, %v496_v21  ;;  %v1748_v34 = vpop.eup %1747  ;;  %v568_v51 = vmul.f32 %v1746_v58, %v2409_v25  ;;  %1124 = vmatprep.mubr.f32.mxu1 %v592_v18 }
 0x161   : > { %1757 = vpow2.f32 %v395_v6  ;;  %v593_v19 = vmul.f32 %v1748_v34, %v2414_v26 }
 0x162   : > { %1759 = vpow2.f32 %v545_v54  ;;  %851 = vmatprep.mubr.f32.mxu0 %v568_v51 }
 0x163   : > { %v1750_v10 = vpop.eup %1749  ;;  %852 = vmatmul.mubr.f32.gmra.mrb[42].mxu0 %v1746_v58  ;;  %1125 = vmatmul.mubr.f32.gmra.mrb[40].mxu1 %v1744_v13 }
 0x164   : > { %v1752_v23 = vpop.eup %1751  ;;  %v569_v59 = vmul.f32 %v1750_v10, %v2417_v29  ;;  %1130 = vmatprep.mubr.f32.mxu1 %v593_v19 }
 0x165   : > { %v594_v39 = vmul.f32 %v1752_v23, %v2422_v30 }
 0x166   : > { %857 = vmatprep.mubr.f32.mxu0 %v569_v59 }
 0x167   : > { %v1754_v63 = vpop.eup %1753  ;;  %858 = vmatmul.mubr.f32.gmra.mrb[44].mxu0 %v1750_v10  ;;  %1131 = vmatmul.mubr.f32.gmra.mrb[42].mxu1 %v1748_v34 }
 0x168   : > { %v1756_v25 = vpop.eup %1755  ;;  %v570_v41 = vmul.f32 %v1754_v63, %v2425_v33  ;;  %1136 = vmatprep.mubr.f32.mxu1 %v594_v39 }
 0x169   : > { %v595_v26 = vmul.f32 %v1756_v25, %v2679_v52 }
 0x16a   : > { %863 = vmatprep.mubr.f32.mxu0 %v570_v41 }
 0x16b   : > { %v1758_v9 = vpop.eup %1757  ;;  %864 = vmatmul.mubr.f32.gmra.mrb[46].mxu0 %v1754_v63  ;;  %1137 = vmatmul.mubr.f32.gmra.mrb[44].mxu1 %v1752_v23 }
 0x16c   : > { %v1760_v15 = vpop.eup %1759  ;;  %v571_v29 = vmul.f32 %v1758_v9, %v2680_v45  ;;  %1142 = vmatprep.mubr.f32.mxu1 %v595_v26 }
 0x16d   : > { %v596_v30 = vmul.f32 %v1760_v15, %v2681_v53 }
 0x16e   : > { %869 = vmatprep.mubr.f32.mxu0 %v571_v29 }
 0x16f   : > { %870 = vmatmul.mubr.f32.gmra.mrb[48].mxu0 %v1758_v9  ;;  %1143 = vmatmul.mubr.f32.gmra.mrb[46].mxu1 %v1756_v25 }
 0x170   : > { %1148 = vmatprep.mubr.f32.mxu1 %v596_v30 }
 0x173   : > { %1149 = vmatmul.mubr.f32.gmra.mrb[48].mxu1 %v1760_v15 }
 0x1e2   : > { %v727_v2 = vpop.f32.mrb[0].mxu0 }
 0x1e3   : > { %v729_v33 = vpop.f32.mrb[1].mxu0 }
 0x1e4   : > { %1761 = vrcp.f32 %v729_v33 }
 0x1e6   : > { %v733_v56 = vpop.f32.mrb[2].mxu0  ;;  %v1006_v8 = vpop.f32.mrb[0].mxu1 }
 0x1e7   : > { %v735_v62 = vpop.f32.mrb[3].mxu0  ;;  %v1008_v16 = vpop.f32.mrb[1].mxu1 }
 0x1e8   : > { %1763 = vrcp.f32 %v735_v62 }
 0x1e9   : > { %1765 = vrcp.f32 %v1008_v16 }
 0x1ea   : > { %v739_v12 = vpop.f32.mrb[4].mxu0  ;;  %v1012_v20 = vpop.f32.mrb[2].mxu1 }
 0x1eb   : > { %v741_v7 = vpop.f32.mrb[5].mxu0  ;;  %v1014_v3 = vpop.f32.mrb[3].mxu1 }
 0x1ec   : > { %1767 = vrcp.f32 %v741_v7 }
 0x1ed   : > { %1769 = vrcp.f32 %v1014_v3 }
 0x1ee   : > { %v1762_v14 = vpop.eup %1761  ;;  %v745_v36 = vpop.f32.mrb[6].mxu0 }
 0x1ef   : > { %v1018_v24 = vpop.f32.mrb[4].mxu1  ;;  %v1156_v32 = vmul.f32 %v1762_v14, %v727_v2  ;;  %v747_v22 = vpop.f32.mrb[7].mxu0 }
 0x1f0   : > { %v1020_v44 = vpop.f32.mrb[5].mxu1  ;;  %1771 = vrcp.f32 %v747_v22 }
 0x1f1   : > { %1773 = vrcp.f32 %v1020_v44 }
 0x1f2   : > { %v1764_v61 = vpop.eup %1763  ;;  %v751_v28 = vpop.f32.mrb[8].mxu0 }
 0x1f3   : > { %v1024_v31 = vpop.f32.mrb[6].mxu1  ;;  %v1766_v47 = vpop.eup %1765  ;;  %v1158_v38 = vmul.f32 %v1764_v61, %v733_v56 }
 0x1f4   : > { %v753_v4 = vpop.f32.mrb[9].mxu0  ;;  %v1026_v48 = vpop.f32.mrb[7].mxu1  ;;  %v1206_v27 = vmul.f32 %v1766_v47, %v1006_v8 }
 0x1f5   : > { %1775 = vrcp.f32 %v753_v4 }
 0x1f6   : > { %1777 = vrcp.f32 %v1026_v48  ;;  %v1768_v50 = vpop.eup %1767  ;;  %v1255_v49 = vadd.f32 %v1206_v27, %v1156_v32  ;;  %v757_v0 = vpop.f32.mrb[10].mxu0 }
 0x1f7   : > { %v1030_v60 = vpop.f32.mrb[8].mxu1  ;;  %v1770_v37 = vpop.eup %1769  ;;  %v1160_v42 = vmul.f32 %v1768_v50, %v739_v12 }
 0x1f8   : > { %v759_v52 = vpop.f32.mrb[11].mxu0  ;;  %v1032_v57 = vpop.f32.mrb[9].mxu1  ;;  %v1287_v11 = vadd.f32 %v2545_v40, %v1255_v49  ;;  %v1208_v5 = vmul.f32 %v1770_v37, %v1012_v20 }
 0x1f9   : > { %1779 = vrcp.f32 %v759_v52 }
 0x1fa   : > { %1781 = vrcp.f32 %v1032_v57  ;;  %v1772_v55 = vpop.eup %1771  ;;  %1312 = vst [vmem:[%s2550_s11] sm:$0xff] %v1287_v11  ;;  %v1256_v46 = vadd.f32 %v1208_v5, %v1158_v38  ;;  %v763_v13 = vpop.f32.mrb[12].mxu0 }
 0x1fb   : > { %v1036_v43 = vpop.f32.mrb[10].mxu1  ;;  %v1774_v17 = vpop.eup %1773  ;;  %v1162_v35 = vmul.f32 %v1772_v55, %v745_v36 }
 0x1fc   : > { %v765_v45 = vpop.f32.mrb[13].mxu0  ;;  %v1038_v1 = vpop.f32.mrb[11].mxu1  ;;  %v1288_v53 = vadd.f32 %v2545_v40, %v1256_v46  ;;  %v1210_v21 = vmul.f32 %v1774_v17, %v1018_v24 }
 0x1fd   : > { %1783 = vrcp.f32 %v765_v45 }
 0x1fe   : > { %1785 = vrcp.f32 %v1038_v1  ;;  %1313 = vst [vmem:[%s2550_s11 + $0x8] sm:$0xff] %v1288_v53  ;;  %v1257_v58 = vadd.f32 %v1210_v21, %v1160_v42  ;;  %v769_v6 = vpop.f32.mrb[14].mxu0  ;;  %v1042_v54 = vpop.f32.mrb[12].mxu1 }
 0x1ff   : > { %v1776_v18 = vpop.eup %1775  ;;  %v771_v19 = vpop.f32.mrb[15].mxu0 }
 0x200   : > { %v1778_v34 = vpop.eup %1777  ;;  %v1164_v51 = vmul.f32 %v1776_v18, %v751_v28  ;;  %v1044_v10 = vpop.f32.mrb[13].mxu1  ;;  %v1289_v23 = vadd.f32 %v2545_v40, %v1257_v58  ;;  %1787 = vrcp.f32 %v771_v19 }
 0x201   : > { %v1212_v59 = vmul.f32 %v1778_v34, %v1024_v31  ;;  %1789 = vrcp.f32 %v1044_v10 }
 0x202   : > { %1314 = vst [vmem:[%s2550_s11 + $0x10] sm:$0xff] %v1289_v23  ;;  %v775_v25 = vpop.f32.mrb[16].mxu0  ;;  %v1048_v41 = vpop.f32.mrb[14].mxu1 }
 0x203   : > { %v1780_v39 = vpop.eup %1779  ;;  %v1258_v63 = vadd.f32 %v1212_v59, %v1162_v35  ;;  %v777_v15 = vpop.f32.mrb[17].mxu0 }
 0x204   : > { %v1782_v26 = vpop.eup %1781  ;;  %v1166_v9 = vmul.f32 %v1780_v39, %v757_v0  ;;  %v1050_v29 = vpop.f32.mrb[15].mxu1  ;;  %1791 = vrcp.f32 %v777_v15 }
 0x205   : > { %v1290_v30 = vadd.f32 %v2545_v40, %v1258_v63  ;;  %v1214_v2 = vmul.f32 %v1782_v26, %v1030_v60  ;;  %1793 = vrcp.f32 %v1050_v29 }
 0x206   : > { %v781_v8 = vpop.f32.mrb[18].mxu0  ;;  %v1054_v62 = vpop.f32.mrb[16].mxu1 }
 0x207   : > { %v1784_v33 = vpop.eup %1783  ;;  %1315 = vst [vmem:[%s2550_s11 + $0x18] sm:$0xff] %v1290_v30  ;;  %v1259_v56 = vadd.f32 %v1214_v2, %v1164_v51  ;;  %v783_v20 = vpop.f32.mrb[19].mxu0 }
 0x208   : > { %v1786_v16 = vpop.eup %1785  ;;  %v1168_v12 = vmul.f32 %v1784_v33, %v763_v13  ;;  %v1056_v7 = vpop.f32.mrb[17].mxu1  ;;  %1795 = vrcp.f32 %v783_v20 }
 0x209   : > { %v1291_v3 = vadd.f32 %v2545_v40, %v1259_v56  ;;  %v1216_v14 = vmul.f32 %v1786_v16, %v1036_v43  ;;  %1797 = vrcp.f32 %v1056_v7 }
 0x20a   : > { %v1788_v36 = vpop.eup %1787  ;;  %v787_v32 = vpop.f32.mrb[20].mxu0 }
 0x20b   : > { %1316 = vst [vmem:[%s2550_s11 + $0x20] sm:$0xff] %v1291_v3  ;;  %v1260_v24 = vadd.f32 %v1216_v14, %v1166_v9  ;;  %v1060_v22 = vpop.f32.mrb[18].mxu1  ;;  %v1790_v44 = vpop.eup %1789  ;;  %v1170_v61 = vmul.f32 %v1788_v36, %v769_v6 }
 0x20c   : > { %v789_v28 = vpop.f32.mrb[21].mxu0  ;;  %v1062_v31 = vpop.f32.mrb[19].mxu1  ;;  %v1218_v38 = vmul.f32 %v1790_v44, %v1042_v54 }
 0x20d   : > { %v1292_v47 = vadd.f32 %v2545_v40, %v1260_v24  ;;  %1799 = vrcp.f32 %v789_v28 }
 0x20e   : > { %1801 = vrcp.f32 %v1062_v31  ;;  %v1792_v4 = vpop.eup %1791  ;;  %v1261_v48 = vadd.f32 %v1218_v38, %v1168_v12  ;;  %v793_v27 = vpop.f32.mrb[22].mxu0 }
 0x20f   : > { %1317 = vst [vmem:[%s2550_s11 + $0x28] sm:$0xff] %v1292_v47  ;;  %v1066_v50 = vpop.f32.mrb[20].mxu1  ;;  %v1794_v49 = vpop.eup %1793  ;;  %v1172_v0 = vmul.f32 %v1792_v4, %v775_v25 }
 0x210   : > { %v795_v60 = vpop.f32.mrb[23].mxu0  ;;  %v1068_v37 = vpop.f32.mrb[21].mxu1  ;;  %v1293_v42 = vadd.f32 %v2545_v40, %v1261_v48  ;;  %v1220_v52 = vmul.f32 %v1794_v49, %v1048_v41 }
 0x211   : > { %1803 = vrcp.f32 %v795_v60 }
 0x212   : > { %1805 = vrcp.f32 %v1068_v37  ;;  %v1796_v57 = vpop.eup %1795  ;;  %1318 = vst [vmem:[%s2550_s11 + $0x30] sm:$0xff] %v1293_v42  ;;  %v1262_v11 = vadd.f32 %v1220_v52, %v1170_v61  ;;  %v799_v5 = vpop.f32.mrb[24].mxu0 }
 0x213   : > { %v1072_v55 = vpop.f32.mrb[22].mxu1  ;;  %v1798_v46 = vpop.eup %1797  ;;  %v1174_v13 = vmul.f32 %v1796_v57, %v781_v8 }
 0x214   : > { %v801_v43 = vpop.f32.mrb[25].mxu0  ;;  %v1074_v17 = vpop.f32.mrb[23].mxu1  ;;  %v1294_v35 = vadd.f32 %v2545_v40, %v1262_v11  ;;  %v1222_v45 = vmul.f32 %v1798_v46, %v1054_v62 }
 0x215   : > { %1807 = vrcp.f32 %v801_v43 }
 0x216   : > { %1809 = vrcp.f32 %v1074_v17  ;;  %1319 = vst [vmem:[%s2550_s11 + $0x38] sm:$0xff] %v1294_v35  ;;  %v1263_v53 = vadd.f32 %v1222_v45, %v1172_v0  ;;  %v805_v21 = vpop.f32.mrb[26].mxu0  ;;  %v1078_v18 = vpop.f32.mrb[24].mxu1 }
 0x217   : > { %v1800_v1 = vpop.eup %1799  ;;  %v807_v54 = vpop.f32.mrb[27].mxu0 }
 0x218   : > { %v1802_v58 = vpop.eup %1801  ;;  %v1176_v6 = vmul.f32 %v1800_v1, %v787_v32  ;;  %v1080_v34 = vpop.f32.mrb[25].mxu1  ;;  %v1295_v51 = vadd.f32 %v2545_v40, %v1263_v53  ;;  %1811 = vrcp.f32 %v807_v54 }
 0x219   : > { %v1224_v19 = vmul.f32 %v1802_v58, %v1060_v22  ;;  %1813 = vrcp.f32 %v1080_v34 }
 0x21a   : > { %1320 = vst [vmem:[%s2550_s11 + $0x40] sm:$0xff] %v1295_v51  ;;  %v811_v59 = vpop.f32.mrb[28].mxu0  ;;  %v1084_v39 = vpop.f32.mrb[26].mxu1 }
 0x21b   : > { %v1804_v10 = vpop.eup %1803  ;;  %v1264_v23 = vadd.f32 %v1224_v19, %v1174_v13  ;;  %v813_v41 = vpop.f32.mrb[29].mxu0 }
 0x21c   : > { %v1806_v63 = vpop.eup %1805  ;;  %v1178_v25 = vmul.f32 %v1804_v10, %v793_v27  ;;  %v1086_v26 = vpop.f32.mrb[27].mxu1  ;;  %1815 = vrcp.f32 %v813_v41 }
 0x21d   : > { %v1296_v9 = vadd.f32 %v2545_v40, %v1264_v23  ;;  %v1226_v15 = vmul.f32 %v1806_v63, %v1066_v50  ;;  %1817 = vrcp.f32 %v1086_v26 }
 0x21e   : > { %v817_v2 = vpop.f32.mrb[30].mxu0  ;;  %v1090_v33 = vpop.f32.mrb[28].mxu1 }
 0x21f   : > { %v1808_v29 = vpop.eup %1807  ;;  %1321 = vst [vmem:[%s2550_s11 + $0x48] sm:$0xff] %v1296_v9  ;;  %v1265_v30 = vadd.f32 %v1226_v15, %v1176_v6  ;;  %v819_v62 = vpop.f32.mrb[31].mxu0 }
 0x220   : > { %v1810_v56 = vpop.eup %1809  ;;  %v1180_v8 = vmul.f32 %v1808_v29, %v799_v5  ;;  %v1092_v16 = vpop.f32.mrb[29].mxu1  ;;  %1819 = vrcp.f32 %v819_v62 }
 0x221   : > { %v1297_v12 = vadd.f32 %v2545_v40, %v1265_v30  ;;  %v1228_v20 = vmul.f32 %v1810_v56, %v1072_v55  ;;  %1821 = vrcp.f32 %v1092_v16 }
 0x222   : > { %v1812_v7 = vpop.eup %1811  ;;  %v823_v14 = vpop.f32.mrb[32].mxu0 }
 0x223   : > { %1322 = vst [vmem:[%s2550_s11 + $0x50] sm:$0xff] %v1297_v12  ;;  %v1266_v3 = vadd.f32 %v1228_v20, %v1178_v25  ;;  %v1096_v36 = vpop.f32.mrb[30].mxu1  ;;  %v1814_v24 = vpop.eup %1813  ;;  %v1182_v32 = vmul.f32 %v1812_v7, %v805_v21 }
 0x224   : > { %v825_v22 = vpop.f32.mrb[33].mxu0  ;;  %v1098_v44 = vpop.f32.mrb[31].mxu1  ;;  %v1230_v28 = vmul.f32 %v1814_v24, %v1078_v18 }
 0x225   : > { %v1298_v61 = vadd.f32 %v2545_v40, %v1266_v3  ;;  %1823 = vrcp.f32 %v825_v22 }
 0x226   : > { %1825 = vrcp.f32 %v1098_v44  ;;  %v1816_v31 = vpop.eup %1815  ;;  %v1267_v47 = vadd.f32 %v1230_v28, %v1180_v8  ;;  %v829_v38 = vpop.f32.mrb[34].mxu0 }
 0x227   : > { %1323 = vst [vmem:[%s2550_s11 + $0x58] sm:$0xff] %v1298_v61  ;;  %v1102_v4 = vpop.f32.mrb[32].mxu1  ;;  %v1818_v48 = vpop.eup %1817  ;;  %v1184_v27 = vmul.f32 %v1816_v31, %v811_v59 }
 0x228   : > { %v831_v50 = vpop.f32.mrb[35].mxu0  ;;  %v1104_v49 = vpop.f32.mrb[33].mxu1  ;;  %v1299_v0 = vadd.f32 %v2545_v40, %v1267_v47  ;;  %v1232_v60 = vmul.f32 %v1818_v48, %v1084_v39 }
 0x229   : > { %1827 = vrcp.f32 %v831_v50 }
 0x22a   : > { %1829 = vrcp.f32 %v1104_v49  ;;  %v1820_v37 = vpop.eup %1819  ;;  %1324 = vst [vmem:[%s2550_s11 + $0x60] sm:$0xff] %v1299_v0  ;;  %v1268_v42 = vadd.f32 %v1232_v60, %v1182_v32  ;;  %v835_v52 = vpop.f32.mrb[36].mxu0 }
 0x22b   : > { %v1108_v57 = vpop.f32.mrb[34].mxu1  ;;  %v1822_v11 = vpop.eup %1821  ;;  %v1186_v5 = vmul.f32 %v1820_v37, %v817_v2 }
 0x22c   : > { %v837_v55 = vpop.f32.mrb[37].mxu0  ;;  %v1110_v46 = vpop.f32.mrb[35].mxu1  ;;  %v1300_v13 = vadd.f32 %v2545_v40, %v1268_v42  ;;  %v1234_v43 = vmul.f32 %v1822_v11, %v1090_v33 }
 0x22d   : > { %1831 = vrcp.f32 %v837_v55 }
 0x22e   : > { %1833 = vrcp.f32 %v1110_v46  ;;  %1325 = vst [vmem:[%s2550_s11 + $0x68] sm:$0xff] %v1300_v13  ;;  %v1269_v35 = vadd.f32 %v1234_v43, %v1184_v27  ;;  %v841_v45 = vpop.f32.mrb[38].mxu0  ;;  %v1114_v1 = vpop.f32.mrb[36].mxu1 }
 0x22f   : > { %v1824_v17 = vpop.eup %1823  ;;  %v843_v18 = vpop.f32.mrb[39].mxu0 }
 0x230   : > { %v1826_v53 = vpop.eup %1825  ;;  %v1188_v21 = vmul.f32 %v1824_v17, %v823_v14  ;;  %v1116_v58 = vpop.f32.mrb[37].mxu1  ;;  %v1301_v6 = vadd.f32 %v2545_v40, %v1269_v35  ;;  %1835 = vrcp.f32 %v843_v18 }
 0x231   : > { %v1236_v54 = vmul.f32 %v1826_v53, %v1096_v36  ;;  %1837 = vrcp.f32 %v1116_v58 }
 0x232   : > { %1326 = vst [vmem:[%s2550_s11 + $0x70] sm:$0xff] %v1301_v6  ;;  %v847_v19 = vpop.f32.mrb[40].mxu0  ;;  %v1120_v10 = vpop.f32.mrb[38].mxu1 }
 0x233   : > { %v1828_v34 = vpop.eup %1827  ;;  %v1270_v51 = vadd.f32 %v1236_v54, %v1186_v5  ;;  %v849_v39 = vpop.f32.mrb[41].mxu0 }
 0x234   : > { %v1830_v23 = vpop.eup %1829  ;;  %v1190_v59 = vmul.f32 %v1828_v34, %v829_v38  ;;  %v1122_v63 = vpop.f32.mrb[39].mxu1  ;;  %1839 = vrcp.f32 %v849_v39 }
 0x235   : > { %v1302_v25 = vadd.f32 %v2545_v40, %v1270_v51  ;;  %v1238_v41 = vmul.f32 %v1830_v23, %v1102_v4  ;;  %1841 = vrcp.f32 %v1122_v63 }
 0x236   : > { %v853_v15 = vpop.f32.mrb[42].mxu0  ;;  %v1126_v29 = vpop.f32.mrb[40].mxu1 }
 0x237   : > { %v1832_v26 = vpop.eup %1831  ;;  %1327 = vst [vmem:[%s2550_s11 + $0x78] sm:$0xff] %v1302_v25  ;;  %v1271_v9 = vadd.f32 %v1238_v41, %v1188_v21  ;;  %v855_v33 = vpop.f32.mrb[43].mxu0 }
 0x238   : > { %v1834_v30 = vpop.eup %1833  ;;  %v1192_v2 = vmul.f32 %v1832_v26, %v835_v52  ;;  %v1128_v56 = vpop.f32.mrb[41].mxu1  ;;  %1843 = vrcp.f32 %v855_v33 }
 0x239   : > { %v1303_v8 = vadd.f32 %v2545_v40, %v1271_v9  ;;  %v1240_v62 = vmul.f32 %v1834_v30, %v1108_v57  ;;  %1845 = vrcp.f32 %v1128_v56 }
 0x23a   : > { %v1836_v16 = vpop.eup %1835  ;;  %v859_v20 = vpop.f32.mrb[44].mxu0 }
 0x23b   : > { %1328 = vst [vmem:[%s2550_s11 + $0x80] sm:$0xff] %v1303_v8  ;;  %v1272_v12 = vadd.f32 %v1240_v62, %v1190_v59  ;;  %v1132_v7 = vpop.f32.mrb[42].mxu1  ;;  %v1838_v3 = vpop.eup %1837  ;;  %v1194_v14 = vmul.f32 %v1836_v16, %v841_v45 }
 0x23c   : > { %v861_v36 = vpop.f32.mrb[45].mxu0  ;;  %v1134_v24 = vpop.f32.mrb[43].mxu1  ;;  %v1242_v22 = vmul.f32 %v1838_v3, %v1114_v1 }
 0x23d   : > { %v1304_v32 = vadd.f32 %v2545_v40, %v1272_v12  ;;  %1847 = vrcp.f32 %v861_v36 }
 0x23e   : > { %1849 = vrcp.f32 %v1134_v24  ;;  %v1840_v44 = vpop.eup %1839  ;;  %v1273_v61 = vadd.f32 %v1242_v22, %v1192_v2  ;;  %v865_v28 = vpop.f32.mrb[46].mxu0 }
 0x23f   : > { %1329 = vst [vmem:[%s2550_s11 + $0x88] sm:$0xff] %v1304_v32  ;;  %v1138_v31 = vpop.f32.mrb[44].mxu1  ;;  %v1842_v47 = vpop.eup %1841  ;;  %v1196_v38 = vmul.f32 %v1840_v44, %v847_v19 }
 0x240   : > { %v867_v4 = vpop.f32.mrb[47].mxu0  ;;  %v1140_v48 = vpop.f32.mrb[45].mxu1  ;;  %v1305_v27 = vadd.f32 %v2545_v40, %v1273_v61  ;;  %v1244_v50 = vmul.f32 %v1842_v47, %v1120_v10 }
 0x241   : > { %1851 = vrcp.f32 %v867_v4 }
 0x242   : > { %1853 = vrcp.f32 %v1140_v48  ;;  %v1844_v49 = vpop.eup %1843  ;;  %1330 = vst [vmem:[%s2550_s11 + $0x90] sm:$0xff] %v1305_v27  ;;  %v1274_v0 = vadd.f32 %v1244_v50, %v1194_v14  ;;  %v871_v60 = vpop.f32.mrb[48].mxu0 }
 0x243   : > { %v1144_v37 = vpop.f32.mrb[46].mxu1  ;;  %v1846_v42 = vpop.eup %1845  ;;  %v1198_v52 = vmul.f32 %v1844_v49, %v853_v15 }
 0x244   : > { %v873_v57 = vpop.f32.mrb[49].mxu0  ;;  %v1146_v11 = vpop.f32.mrb[47].mxu1  ;;  %v1306_v5 = vadd.f32 %v2545_v40, %v1274_v0  ;;  %v1246_v55 = vmul.f32 %v1846_v42, %v1126_v29 }
 0x245   : > { %1855 = vrcp.f32 %v873_v57 }
 0x246   : > { %1857 = vrcp.f32 %v1146_v11  ;;  %1331 = vst [vmem:[%s2550_s11 + $0x98] sm:$0xff] %v1306_v5  ;;  %v1275_v13 = vadd.f32 %v1246_v55, %v1196_v38  ;;  %v1150_v43 = vpop.f32.mrb[48].mxu1 }
 0x247   : > { %v1848_v46 = vpop.eup %1847  ;;  %v1152_v45 = vpop.f32.mrb[49].mxu1 }
 0x248   : > { %v1850_v17 = vpop.eup %1849  ;;  %v1200_v35 = vmul.f32 %v1848_v46, %v859_v20  ;;  %v1307_v1 = vadd.f32 %v2545_v40, %v1275_v13  ;;  %1859 = vrcp.f32 %v1152_v45 }
 0x249   : > { %v1248_v53 = vmul.f32 %v1850_v17, %v1132_v7 }
 0x24a   : > { %1332 = vst [vmem:[%s2550_s11 + $0xa0] sm:$0xff] %v1307_v1 }
 0x24b   : > { %v1852_v21 = vpop.eup %1851  ;;  %v1276_v18 = vadd.f32 %v1248_v53, %v1198_v52 }
 0x24c   : > { %v1854_v58 = vpop.eup %1853  ;;  %v1202_v6 = vmul.f32 %v1852_v21, %v865_v28 }
 0x24d   : > { %v1308_v54 = vadd.f32 %v2545_v40, %v1276_v18  ;;  %v1250_v34 = vmul.f32 %v1854_v58, %v1138_v31 }
 0x24f   : > { %v1856_v51 = vpop.eup %1855  ;;  %1333 = vst [vmem:[%s2550_s11 + $0xa8] sm:$0xff] %v1308_v54  ;;  %v1277_v19 = vadd.f32 %v1250_v34, %v1200_v35 }
 0x250   : > { %v1858_v10 = vpop.eup %1857  ;;  %v1204_v23 = vmul.f32 %v1856_v51, %v871_v60 }
 0x251   : > { %v1309_v59 = vadd.f32 %v2545_v40, %v1277_v19  ;;  %v1252_v39 = vmul.f32 %v1858_v10, %v1144_v37 }
 0x252   : > { %v1860_v63 = vpop.eup %1859 }
 0x253   : > { %1334 = vst [vmem:[%s2550_s11 + $0xb0] sm:$0xff] %v1309_v59  ;;  %v1278_v25 = vadd.f32 %v1252_v39, %v1202_v6  ;;  %v1254_v41 = vmul.f32 %v1860_v63, %v1150_v43 }
 0x255   : > { %v1310_v26 = vadd.f32 %v2545_v40, %v1278_v25  ;;  %v1279_v9 = vadd.f32 %v1254_v41, %v1204_v23 }
 0x257   : > { %1335 = vst [vmem:[%s2550_s11 + $0xb8] sm:$0xff] %v1310_v26  ;;  %v1311_v15 = vadd.f32 %v2545_v40, %v1279_v9 }
 0x259   : > { %1336 = vst [vmem:[%s2550_s11 + $0xc0] sm:$0xff] %v1311_v15 }
 0x25a   : > { %1960 = shalt.err (!%p1957_p2)
}
 0x25b   : > { %s1961_s25 = scalar_lea.hbm %s2604_s20, 3200  ;;  %s1965_s10 = scalar_lea.hbm %s2656_s4, 6400 }
 0x25c   : > { %p1962_p13 = scmp.ne.s32.totalorder %s2604_s20, %s1961_s25  ;;  %p1966_p4 = scmp.lt.u32.totalorder %s2604_s20, %s2656_s4 }
 0x25d   : > { %p1967_p5 = scmp.lt.u32.totalorder %s1965_s10, %s1961_s25  ;;  %p1969_p11 = scmp.lt.u32.totalorder %s1961_s25, %s2604_s20 }
 0x25e   : > { %p1963_p6 = pnand %p1962_p13, %p2682_p0 }
 0x25f   : > { %p1968_p8 = por %p1967_p5, %p1966_p4 }
 0x260   : > { %p1964_p10 = pneg %p1963_p6 }
 0x261   : > { %p1970_p1 = por %p1969_p11, %p1968_p8 }
 0x263   : > { %p1971_p3 = pnand %p1970_p1, %p1964_p10 }
 0x265   : > { %1974 = shalt.err (!%p1971_p3)
}
 0x266   : > { %s2027_s11 = smov 128   ;;  %s2028_s29 = smov 8  }
 0x267   : > { %1598 = dma.vmem_to_hbm [thread:$0]  (%p2682_p0), %s2606_s5, 3200, %s2604_s20, %s1338_s19, %s2027_s11, %s2027_s11, %s2028_s29  }
 0x268 PF: > { %s1366_s6 = sand.u32 1, %s2005_s15   ;;  %p2683_p7 = scmp.ne.s32.totalorder %s2667_s22, 0 }
 0x269   : > { %p2684_p9 = scmp.ge.s32.totalorder %s2017_s18, 2  ;;  %s1367_s28 = scalar_lea.sflag [#allocation4], %s1366_s6 }
 0x26b   : > { %p1612_p12 = pnand %p2684_p9, %p2683_p7 }
 0x26d   : > { %2000 = dma.done.wait (!%p1612_p12), %s1367_s28, 3200  }
 0x26e   : > { %2002 = vsyncadd (!%p1612_p12), %s1367_s28, 4294964096  ;;  %p18_p2 = scmp.ge.s32.totalorder %s2164_s9, 4   ;;  %s2685_s15 = smov %s2009_s16 }
 0x26f   : > { %s2686_s16 = smov %s2013_s17  ;;  %s2687_s17 = smov %s2180_s14 }
 0x270   : > { %s2688_s18 = smov %s2164_s9  ;;  %20 = sbr.rel (!%p18_p2) target bundleno = 6 (0x6), region = 89 }
 0x277   :  { %1372 = vsyncpa [#allocation3], 1 }
 0x278   :  { %1374 = vsyncpa [#allocation3 + $0x1], 1 }
 0x279   :  { %1375 = vsyncpa [#allocation6], 1 }
 0x27a   :  { %1376 = vsyncpa [#allocation4], 1 }
 0x27b   :  { %1378 = vsyncpa [#allocation4 + $0x1], 1 }

</bundles_post_ra>
